<compile_context>
chip_gen: v7x
topology: tpu7x:2x2x1
jax: 0.10.0
libtpu: 0.0.40
codegen_flags: <defaults>
</compile_context>

<pallas_src>
import functools

import jax
import jax.numpy as jnp
from jax.experimental import pallas as pl
from jax.experimental.pallas import tpu as pltpu


# ----------------------------------------------------------------------------
# In-kernel helpers
# ----------------------------------------------------------------------------
def _select_matrix(n_in, n_groups, stride, offset):
    """(n_in, n_groups) f32 matrix S with S[offset + stride*g, g] = 1, else 0."""
    rows = jax.lax.broadcasted_iota(jnp.int32, (n_in, n_groups), 0)
    cols = jax.lax.broadcasted_iota(jnp.int32, (n_in, n_groups), 1)
    return (rows == stride * cols + offset).astype(jnp.float32)


def _rodrigues_rows(rx, ry, rz):
    """Axis-angle -> 9 row-major rotation entries.  Matches RotationContinuity's
    compute_rotation_matrix_from_Rodriguez (full-angle cos/sin quirk, eps=1e-8 on the norm).
    Component arrays are (B, n_rot)."""
    sq = jnp.maximum(rx * rx + ry * ry + rz * rz, 1e-16)
    inv_theta = jax.lax.rsqrt(sq)          # = 1 / max(|r|, 1e-8)
    theta = sq * inv_theta                 # = max(|r|, 1e-8)
    ax, ay, az = rx * inv_theta, ry * inv_theta, rz * inv_theta
    s = jnp.sin(theta)
    qw = jnp.cos(theta)
    qx, qy, qz = ax * s, ay * s, az * s
    xx, yy, zz = qx * qx, qy * qy, qz * qz
    xy, xz, yz = qx * qy, qx * qz, qy * qz
    xw, yw, zw = qx * qw, qy * qw, qz * qw
    return (1 - 2 * yy - 2 * zz, 2 * xy - 2 * zw, 2 * xz + 2 * yw,
            2 * xy + 2 * zw, 1 - 2 * xx - 2 * zz, 2 * yz - 2 * xw,
            2 * xz - 2 * yw, 2 * yz + 2 * xw, 1 - 2 * xx - 2 * yy)


def _ortho6d_rows(x0, x1, x2, y0, y1, y2):
    """6D -> 9 row-major rotation entries (matrix columns are x, y=cross(z,x), z)."""
    inv_xm = jax.lax.rsqrt(jnp.maximum(x0 * x0 + x1 * x1 + x2 * x2, 1e-16))
    x0, x1, x2 = x0 * inv_xm, x1 * inv_xm, x2 * inv_xm
    z0 = x1 * y2 - x2 * y1
    z1 = x2 * y0 - x0 * y2
    z2 = x0 * y1 - x1 * y0
    inv_zm = jax.lax.rsqrt(jnp.maximum(z0 * z0 + z1 * z1 + z2 * z2, 1e-16))
    z0, z1, z2 = z0 * inv_zm, z1 * inv_zm, z2 * inv_zm
    w0 = z1 * x2 - z2 * x1
    w1 = z2 * x0 - z0 * x2
    w2 = z0 * x1 - z1 * x0
    return (x0, w0, z0, x1, w1, z1, x2, w2, z2)


def _sum_all_keep11(a):
    # 2D array -> (1, 1): lane reduce then sublane reduce.
    s = jnp.sum(a, axis=1, keepdims=True)
    return jnp.sum(s, axis=0, keepdims=True)


# ----------------------------------------------------------------------------
# Fused kernel: MLP forward + rotation/position MSE + l2 weight regularization
# ----------------------------------------------------------------------------
def fused_forward_loss_kernel(*refs, n_layers, reg_weight):
    x_ref, gt_ref = refs[0], refs[1]
    wb_refs = refs[2:2 + 2 * n_layers]
    o_ref = refs[2 + 2 * n_layers]

    x = x_ref[...]                         # (B, 51)
    gt = gt_ref[...]                       # (B, 51)
    B, in_dim = x.shape

    # ---- MLP forward (dropout = identity in eval mode) ----
    h = x
    weights = []
    for i in range(n_layers):
        w = wb_refs[2 * i][...]
        b = wb_refs[2 * i + 1][...]
        weights.append(w)
        h = jnp.dot(h, w, preferred_element_type=jnp.float32) + b
        if i < n_layers - 1:
            h = jnp.maximum(h, 0.01 * h)   # nn.LeakyReLU(0.01)
    pred = h                               # (B, 99)
    out_dim = pred.shape[1]
    n_rot = (in_dim - 3) // 3              # 16 rotations per sample

    # ---- in-kernel "reshape/transpose": component extraction via 0/1 selection matmuls ----
    s_rod = [_select_matrix(in_dim, n_rot, 3, 3 + c) for c in range(3)]
    xr = [jnp.dot(x, s, preferred_element_type=jnp.float32) for s in s_rod]    # 3 x (B, 16)
    gr = [jnp.dot(gt, s, preferred_element_type=jnp.float32) for s in s_rod]   # 3 x (B, 16)
    s_o6 = [_select_matrix(out_dim, n_rot, 6, 3 + c) for c in range(6)]
    p6 = [jnp.dot(pred, s, preferred_element_type=jnp.float32) for s in s_o6]  # 6 x (B, 16)
    s_pos_in = _select_matrix(in_dim, 3, 1, 0)
    s_pos_out = _select_matrix(out_dim, 3, 1, 0)
    x_pos = jnp.dot(x, s_pos_in, preferred_element_type=jnp.float32)    # (B, 3)
    g_pos = jnp.dot(gt, s_pos_in, preferred_element_type=jnp.float32)   # (B, 3)
    p_pos = jnp.dot(pred, s_pos_out, preferred_element_type=jnp.float32)  # (B, 3)

    # ---- rotation matrices and MSE(pred_rot, gt_rot): single accumulator, one reduction ----
    res = _rodrigues_rows(*xr)             # 9 x (B, n_rot)
    gtr = _rodrigues_rows(*gr)
    dif = _ortho6d_rows(*p6)
    acc = None
    for i in range(3):
        for k in range(3):
            pr = (res[3 * i + 0] * dif[0 + k]
                  + res[3 * i + 1] * dif[3 + k]
                  + res[3 * i + 2] * dif[6 + k])
            d = pr - gtr[3 * i + k]
            acc = d * d if acc is None else acc + d * d
    rot_mse = _sum_all_keep11(acc) * (1.0 / float(9 * B * n_rot))

    # ---- position MSE ----
    dpos = (x_pos + p_pos) - g_pos         # (B, 3)
    pos_mse = _sum_all_keep11(dpos * dpos) * (1.0 / float(3 * B))

    # ---- l2 weight regularization (weights already resident in VMEM) ----
    reg = jnp.zeros((1, 1), jnp.float32)
    for w in weights:
        reg = reg + jnp.sqrt(_sum_all_keep11(w * w))

    o_ref[...] = rot_mse + pos_mse + reg * jnp.float32(reg_weight)


# ----------------------------------------------------------------------------
# Wrapper: one pallas_call, zero wrapper-side layout ops
# ----------------------------------------------------------------------------
def model_with_loss_forward(params, x, gt, reg_weight):
    """params: list of (W, b), W:(in,out), b:(1,out).  reg_weight: static Python float."""
    n_layers = len(params)
    flat = []
    for w, b in params:
        flat.extend((w, b))

    kernel = functools.partial(fused_forward_loss_kernel,
                               n_layers=n_layers, reg_weight=float(reg_weight))
    in_specs = [pl.BlockSpec(a.shape, lambda i: (0, 0)) for a in (x, gt, *flat)]

    loss = pl.pallas_call(
        kernel,
        out_shape=jax.ShapeDtypeStruct((1, 1), jnp.float32),
        grid=(1,),  # whole problem fits one TC; tile B with a "parallel" axis if B grows (v7x)
        in_specs=in_specs,
        out_specs=pl.BlockSpec((1, 1), lambda i: (0, 0)),
        compiler_params=pltpu.CompilerParams(dimension_semantics=("arbitrary",)),
    )(x, gt, *flat)
    return loss[0, 0]


# ----------------------------------------------------------------------------
# Pure-JAX reference (for sanity check) and init
# ----------------------------------------------------------------------------
def _reference_loss(params, x, gt, reg_weight):
    h = x
    for i, (w, b) in enumerate(params):
        h = h @ w + b
        if i < len(params) - 1:
            h = jnp.where(h >= 0, h, 0.01 * h)
    pred = h

    def rod_to_mat(r):
        theta = jnp.maximum(jnp.sqrt(jnp.sum(r * r, axis=1)), 1e-8)
        ax = r / theta[:, None]
        s, qw = jnp.sin(theta), jnp.cos(theta)
        qx, qy, qz = ax[:, 0] * s, ax[:, 1] * s, ax[:, 2] * s
        xx, yy, zz = qx * qx, qy * qy, qz * qz
        xy, xz, yz = qx * qy, qx * qz, qy * qz
        xw, yw, zw = qx * qw, qy * qw, qz * qw
        m = jnp.stack([1 - 2 * yy - 2 * zz, 2 * xy - 2 * zw, 2 * xz + 2 * yw,
                       2 * xy + 2 * zw, 1 - 2 * xx - 2 * zz, 2 * yz - 2 * xw,
                       2 * xz - 2 * yw, 2 * yz + 2 * xw, 1 - 2 * xx - 2 * yy], axis=1)
        return m.reshape(-1, 3, 3)

    def ortho6d_to_mat(p):
        xr, yr = p[:, 0:3], p[:, 3:6]
        xn = xr / jnp.maximum(jnp.linalg.norm(xr, axis=1, keepdims=True), 1e-8)
        z = jnp.cross(xn, yr)
        zn = z / jnp.maximum(jnp.linalg.norm(z, axis=1, keepdims=True), 1e-8)
        y = jnp.cross(zn, xn)
        return jnp.stack([xn, y, zn], axis=2)

    res = rod_to_mat(x[:, 3:3 + 16 * 3].reshape(-1, 3))
    dif = ortho6d_to_mat(pred[:, 3:].reshape(-1, 6))
    pred_rot = jnp.matmul(res, dif)
    gt_rot = rod_to_mat(gt[:, 3:].reshape(-1, 3))
    loss = jnp.mean((pred_rot - gt_rot) ** 2)
    loss = loss + jnp.mean(((x[:, :3] + pred[:, :3]) - gt[:, :3]) ** 2)
    for w, _ in params:
        loss = loss + jnp.sqrt(jnp.sum(w * w)) * reg_weight
    return loss


def init_params(key, h_size):
    # PyTorch nn.Linear default init: U(-1/sqrt(fan_in), 1/sqrt(fan_in)).
    # Weights stored transposed as (in, out) so the kernel computes x @ W + b.
    params = []
    keys = jax.random.split(key, len(h_size) - 1)
    for k, fan_in, fan_out in zip(keys, h_size[:-1], h_size[1:]):
        kw, kb = jax.random.split(k)
        bound = 1.0 / float(fan_in) ** 0.5
        w = jax.random.uniform(kw, (fan_in, fan_out), jnp.float32, -bound, bound)
        b = jax.random.uniform(kb, (1, fan_out), jnp.float32, -bound, bound)
        params.append((w, b))
    return params


if __name__ == "__main__":
    # cfg.MODEL: TYPE='mlp', DIM_HIDDEN=32, NUM_HIDDEN=2, DIM_HIDDEN_FACT=1.0,
    #            P_DROPOUT=0.5, PRED_LOSS='mse', REG_TYPE='l2', REG_WEIGHT=1e-3
    DIM_HIDDEN, NUM_HIDDEN, DIM_HIDDEN_FACT = 32, 2, 1.0
    REG_WEIGHT = 1e-3

    B = 8
    input_size = 3 + 16 * 3    # 51: position (3) + 16 Rodriguez rotations (48)
    output_size = 3 + 16 * 6   # 99: delta position (3) + 16 ortho6d rotations (96)

    # h_size exactly as in MLP.__init__  -> [51, 32, 32, 99]
    h_size = [input_size]
    dim_h = DIM_HIDDEN
    for _ in range(NUM_HIDDEN):
        h_size.append(dim_h)
        dim_h = int(dim_h * DIM_HIDDEN_FACT)
    h_size.append(output_size)

    key = jax.random.PRNGKey(0)
    kx, kg, kp = jax.random.split(key, 3)
    x = jax.random.normal(kx, (B, input_size), jnp.float32)    # data_dict['input']
    gt = jax.random.normal(kg, (B, input_size), jnp.float32)   # data_dict['gt']
    params = init_params(kp, h_size)

    loss = model_with_loss_forward(params, x, gt, REG_WEIGHT)
    loss = jax.block_until_ready(loss)
    assert loss.shape == () and bool(jnp.isfinite(loss))

    # loose sanity check against a pure-JAX reference (MXU precision differences allowed)
    ref = float(jax.block_until_ready(_reference_loss(params, x, gt, REG_WEIGHT)))
    rel_err = abs(float(loss) - ref) / max(abs(ref), 1e-6)
    assert rel_err < 5e-2, (float(loss), ref, rel_err)

    print("KERNEL_OK")
</pallas_src>

<mosaic_0001>
module attributes {stable_mosaic.version = 11 : i64} {
  func.func @fused_forward_loss_kernel(%arg0: i32, %arg1: memref<8x51xf32, #tpu.memory_space<vmem>>, %arg2: memref<8x51xf32, #tpu.memory_space<vmem>>, %arg3: memref<51x32xf32, #tpu.memory_space<vmem>>, %arg4: memref<1x32xf32, #tpu.memory_space<vmem>>, %arg5: memref<32x32xf32, #tpu.memory_space<vmem>>, %arg6: memref<1x32xf32, #tpu.memory_space<vmem>>, %arg7: memref<32x99xf32, #tpu.memory_space<vmem>>, %arg8: memref<1x99xf32, #tpu.memory_space<vmem>>, %arg9: memref<1x1xf32, #tpu.memory_space<vmem>>) attributes {dimension_semantics = [#tpu.dimension_semantics<arbitrary>], iteration_bounds = array<i64: 1>, scalar_prefetch = 0 : i64, scratch_operands = 0 : i64, tpu.core_type = #tpu.core_type<tc>, window_params = [{pipeline_mode = #tpu.pipeline_mode<synchronous>, transform_indices = @transform_0, window_bounds = array<i64: 8, 51>}, {pipeline_mode = #tpu.pipeline_mode<synchronous>, transform_indices = @transform_1, window_bounds = array<i64: 8, 51>}, {pipeline_mode = #tpu.pipeline_mode<synchronous>, transform_indices = @transform_2, window_bounds = array<i64: 51, 32>}, {pipeline_mode = #tpu.pipeline_mode<synchronous>, transform_indices = @transform_3, window_bounds = array<i64: 1, 32>}, {pipeline_mode = #tpu.pipeline_mode<synchronous>, transform_indices = @transform_4, window_bounds = array<i64: 32, 32>}, {pipeline_mode = #tpu.pipeline_mode<synchronous>, transform_indices = @transform_5, window_bounds = array<i64: 1, 32>}, {pipeline_mode = #tpu.pipeline_mode<synchronous>, transform_indices = @transform_6, window_bounds = array<i64: 32, 99>}, {pipeline_mode = #tpu.pipeline_mode<synchronous>, transform_indices = @transform_7, window_bounds = array<i64: 1, 99>}, {pipeline_mode = #tpu.pipeline_mode<synchronous>, transform_indices = @transform_8, window_bounds = array<i64: 1, 1>}]} {
    %c0 = arith.constant 0 : index
    %c0_0 = arith.constant 0 : index
    %0 = vector.load %arg1[%c0, %c0_0] : memref<8x51xf32, #tpu.memory_space<vmem>>, vector<8x51xf32>
    %c0_1 = arith.constant 0 : index
    %c0_2 = arith.constant 0 : index
    %1 = vector.load %arg2[%c0_1, %c0_2] : memref<8x51xf32, #tpu.memory_space<vmem>>, vector<8x51xf32>
    %c0_3 = arith.constant 0 : index
    %c0_4 = arith.constant 0 : index
    %2 = vector.load %arg3[%c0_3, %c0_4] : memref<51x32xf32, #tpu.memory_space<vmem>>, vector<51x32xf32>
    %c0_5 = arith.constant 0 : index
    %c0_6 = arith.constant 0 : index
    %3 = vector.load %arg4[%c0_5, %c0_6] : memref<1x32xf32, #tpu.memory_space<vmem>>, vector<1x32xf32>
    %cst = arith.constant dense<0.000000e+00> : vector<8x32xf32>
    %4 = tpu.matmul %0, %2, %cst {dimension_numbers = #tpu.dot_dimension_numbers<[1], [0], [0], [1], [0, 0, 1, 1], [], []>} : vector<8x51xf32>, vector<51x32xf32>, vector<8x32xf32> -> vector<8x32xf32>
    %5 = vector.broadcast %3 : vector<1x32xf32> to vector<8x32xf32>
    %6 = arith.addf %4, %5 : vector<8x32xf32>
    %cst_7 = arith.constant 0.00999999977 : f32
    %7 = vector.broadcast %cst_7 : f32 to vector<8x32xf32>
    %8 = arith.mulf %7, %6 : vector<8x32xf32>
    %9 = arith.maximumf %6, %8 : vector<8x32xf32>
    %c0_8 = arith.constant 0 : index
    %c0_9 = arith.constant 0 : index
    %10 = vector.load %arg5[%c0_8, %c0_9] : memref<32x32xf32, #tpu.memory_space<vmem>>, vector<32x32xf32>
    %c0_10 = arith.constant 0 : index
    %c0_11 = arith.constant 0 : index
    %11 = vector.load %arg6[%c0_10, %c0_11] : memref<1x32xf32, #tpu.memory_space<vmem>>, vector<1x32xf32>
    %cst_12 = arith.constant dense<0.000000e+00> : vector<8x32xf32>
    %12 = tpu.matmul %9, %10, %cst_12 {dimension_numbers = #tpu.dot_dimension_numbers<[1], [0], [0], [1], [0, 0, 1, 1], [], []>} : vector<8x32xf32>, vector<32x32xf32>, vector<8x32xf32> -> vector<8x32xf32>
    %13 = vector.broadcast %11 : vector<1x32xf32> to vector<8x32xf32>
    %14 = arith.addf %12, %13 : vector<8x32xf32>
    %cst_13 = arith.constant 0.00999999977 : f32
    %15 = vector.broadcast %cst_13 : f32 to vector<8x32xf32>
    %16 = arith.mulf %15, %14 : vector<8x32xf32>
    %17 = arith.maximumf %14, %16 : vector<8x32xf32>
    %c0_14 = arith.constant 0 : index
    %c0_15 = arith.constant 0 : index
    %18 = vector.load %arg7[%c0_14, %c0_15] : memref<32x99xf32, #tpu.memory_space<vmem>>, vector<32x99xf32>
    %c0_16 = arith.constant 0 : index
    %c0_17 = arith.constant 0 : index
    %19 = vector.load %arg8[%c0_16, %c0_17] : memref<1x99xf32, #tpu.memory_space<vmem>>, vector<1x99xf32>
    %cst_18 = arith.constant dense<0.000000e+00> : vector<8x99xf32>
    %20 = tpu.matmul %17, %18, %cst_18 {dimension_numbers = #tpu.dot_dimension_numbers<[1], [0], [0], [1], [0, 0, 1, 1], [], []>} : vector<8x32xf32>, vector<32x99xf32>, vector<8x99xf32> -> vector<8x99xf32>
    %21 = vector.broadcast %19 : vector<1x99xf32> to vector<8x99xf32>
    %22 = arith.addf %20, %21 : vector<8x99xf32>
    %23 = tpu.iota {dimensions = array<i32: 0>} : vector<51x16xi32>
    %24 = tpu.iota {dimensions = array<i32: 1>} : vector<51x16xi32>
    %c3_i32 = arith.constant 3 : i32
    %25 = vector.broadcast %c3_i32 : i32 to vector<51x16xi32>
    %26 = arith.muli %25, %24 : vector<51x16xi32>
    %c3_i32_19 = arith.constant 3 : i32
    %27 = vector.broadcast %c3_i32_19 : i32 to vector<51x16xi32>
    %28 = arith.addi %26, %27 : vector<51x16xi32>
    %29 = arith.cmpi eq, %23, %28 : vector<51x16xi32>
    %30 = arith.extui %29 : vector<51x16xi1> to vector<51x16xi32>
    %31 = arith.sitofp %30 : vector<51x16xi32> to vector<51x16xf32>
    %32 = tpu.iota {dimensions = array<i32: 0>} : vector<51x16xi32>
    %33 = tpu.iota {dimensions = array<i32: 1>} : vector<51x16xi32>
    %c3_i32_20 = arith.constant 3 : i32
    %34 = vector.broadcast %c3_i32_20 : i32 to vector<51x16xi32>
    %35 = arith.muli %34, %33 : vector<51x16xi32>
    %c4_i32 = arith.constant 4 : i32
    %36 = vector.broadcast %c4_i32 : i32 to vector<51x16xi32>
    %37 = arith.addi %35, %36 : vector<51x16xi32>
    %38 = arith.cmpi eq, %32, %37 : vector<51x16xi32>
    %39 = arith.extui %38 : vector<51x16xi1> to vector<51x16xi32>
    %40 = arith.sitofp %39 : vector<51x16xi32> to vector<51x16xf32>
    %41 = tpu.iota {dimensions = array<i32: 0>} : vector<51x16xi32>
    %42 = tpu.iota {dimensions = array<i32: 1>} : vector<51x16xi32>
    %c3_i32_21 = arith.constant 3 : i32
    %43 = vector.broadcast %c3_i32_21 : i32 to vector<51x16xi32>
    %44 = arith.muli %43, %42 : vector<51x16xi32>
    %c5_i32 = arith.constant 5 : i32
    %45 = vector.broadcast %c5_i32 : i32 to vector<51x16xi32>
    %46 = arith.addi %44, %45 : vector<51x16xi32>
    %47 = arith.cmpi eq, %41, %46 : vector<51x16xi32>
    %48 = arith.extui %47 : vector<51x16xi1> to vector<51x16xi32>
    %49 = arith.sitofp %48 : vector<51x16xi32> to vector<51x16xf32>
    %cst_22 = arith.constant dense<0.000000e+00> : vector<8x16xf32>
    %50 = tpu.matmul %0, %31, %cst_22 {dimension_numbers = #tpu.dot_dimension_numbers<[1], [0], [0], [1], [0, 0, 1, 1], [], []>} : vector<8x51xf32>, vector<51x16xf32>, vector<8x16xf32> -> vector<8x16xf32>
    %cst_23 = arith.constant dense<0.000000e+00> : vector<8x16xf32>
    %51 = tpu.matmul %0, %40, %cst_23 {dimension_numbers = #tpu.dot_dimension_numbers<[1], [0], [0], [1], [0, 0, 1, 1], [], []>} : vector<8x51xf32>, vector<51x16xf32>, vector<8x16xf32> -> vector<8x16xf32>
    %cst_24 = arith.constant dense<0.000000e+00> : vector<8x16xf32>
    %52 = tpu.matmul %0, %49, %cst_24 {dimension_numbers = #tpu.dot_dimension_numbers<[1], [0], [0], [1], [0, 0, 1, 1], [], []>} : vector<8x51xf32>, vector<51x16xf32>, vector<8x16xf32> -> vector<8x16xf32>
    %cst_25 = arith.constant dense<0.000000e+00> : vector<8x16xf32>
    %53 = tpu.matmul %1, %31, %cst_25 {dimension_numbers = #tpu.dot_dimension_numbers<[1], [0], [0], [1], [0, 0, 1, 1], [], []>} : vector<8x51xf32>, vector<51x16xf32>, vector<8x16xf32> -> vector<8x16xf32>
    %cst_26 = arith.constant dense<0.000000e+00> : vector<8x16xf32>
    %54 = tpu.matmul %1, %40, %cst_26 {dimension_numbers = #tpu.dot_dimension_numbers<[1], [0], [0], [1], [0, 0, 1, 1], [], []>} : vector<8x51xf32>, vector<51x16xf32>, vector<8x16xf32> -> vector<8x16xf32>
    %cst_27 = arith.constant dense<0.000000e+00> : vector<8x16xf32>
    %55 = tpu.matmul %1, %49, %cst_27 {dimension_numbers = #tpu.dot_dimension_numbers<[1], [0], [0], [1], [0, 0, 1, 1], [], []>} : vector<8x51xf32>, vector<51x16xf32>, vector<8x16xf32> -> vector<8x16xf32>
    %56 = tpu.iota {dimensions = array<i32: 0>} : vector<99x16xi32>
    %57 = tpu.iota {dimensions = array<i32: 1>} : vector<99x16xi32>
    %c6_i32 = arith.constant 6 : i32
    %58 = vector.broadcast %c6_i32 : i32 to vector<99x16xi32>
    %59 = arith.muli %58, %57 : vector<99x16xi32>
    %c3_i32_28 = arith.constant 3 : i32
    %60 = vector.broadcast %c3_i32_28 : i32 to vector<99x16xi32>
    %61 = arith.addi %59, %60 : vector<99x16xi32>
    %62 = arith.cmpi eq, %56, %61 : vector<99x16xi32>
    %63 = arith.extui %62 : vector<99x16xi1> to vector<99x16xi32>
    %64 = arith.sitofp %63 : vector<99x16xi32> to vector<99x16xf32>
    %65 = tpu.iota {dimensions = array<i32: 0>} : vector<99x16xi32>
    %66 = tpu.iota {dimensions = array<i32: 1>} : vector<99x16xi32>
    %c6_i32_29 = arith.constant 6 : i32
    %67 = vector.broadcast %c6_i32_29 : i32 to vector<99x16xi32>
    %68 = arith.muli %67, %66 : vector<99x16xi32>
    %c4_i32_30 = arith.constant 4 : i32
    %69 = vector.broadcast %c4_i32_30 : i32 to vector<99x16xi32>
    %70 = arith.addi %68, %69 : vector<99x16xi32>
    %71 = arith.cmpi eq, %65, %70 : vector<99x16xi32>
    %72 = arith.extui %71 : vector<99x16xi1> to vector<99x16xi32>
    %73 = arith.sitofp %72 : vector<99x16xi32> to vector<99x16xf32>
    %74 = tpu.iota {dimensions = array<i32: 0>} : vector<99x16xi32>
    %75 = tpu.iota {dimensions = array<i32: 1>} : vector<99x16xi32>
    %c6_i32_31 = arith.constant 6 : i32
    %76 = vector.broadcast %c6_i32_31 : i32 to vector<99x16xi32>
    %77 = arith.muli %76, %75 : vector<99x16xi32>
    %c5_i32_32 = arith.constant 5 : i32
    %78 = vector.broadcast %c5_i32_32 : i32 to vector<99x16xi32>
    %79 = arith.addi %77, %78 : vector<99x16xi32>
    %80 = arith.cmpi eq, %74, %79 : vector<99x16xi32>
    %81 = arith.extui %80 : vector<99x16xi1> to vector<99x16xi32>
    %82 = arith.sitofp %81 : vector<99x16xi32> to vector<99x16xf32>
    %83 = tpu.iota {dimensions = array<i32: 0>} : vector<99x16xi32>
    %84 = tpu.iota {dimensions = array<i32: 1>} : vector<99x16xi32>
    %c6_i32_33 = arith.constant 6 : i32
    %85 = vector.broadcast %c6_i32_33 : i32 to vector<99x16xi32>
    %86 = arith.muli %85, %84 : vector<99x16xi32>
    %c6_i32_34 = arith.constant 6 : i32
    %87 = vector.broadcast %c6_i32_34 : i32 to vector<99x16xi32>
    %88 = arith.addi %86, %87 : vector<99x16xi32>
    %89 = arith.cmpi eq, %83, %88 : vector<99x16xi32>
    %90 = arith.extui %89 : vector<99x16xi1> to vector<99x16xi32>
    %91 = arith.sitofp %90 : vector<99x16xi32> to vector<99x16xf32>
    %92 = tpu.iota {dimensions = array<i32: 0>} : vector<99x16xi32>
    %93 = tpu.iota {dimensions = array<i32: 1>} : vector<99x16xi32>
    %c6_i32_35 = arith.constant 6 : i32
    %94 = vector.broadcast %c6_i32_35 : i32 to vector<99x16xi32>
    %95 = arith.muli %94, %93 : vector<99x16xi32>
    %c7_i32 = arith.constant 7 : i32
    %96 = vector.broadcast %c7_i32 : i32 to vector<99x16xi32>
    %97 = arith.addi %95, %96 : vector<99x16xi32>
    %98 = arith.cmpi eq, %92, %97 : vector<99x16xi32>
    %99 = arith.extui %98 : vector<99x16xi1> to vector<99x16xi32>
    %100 = arith.sitofp %99 : vector<99x16xi32> to vector<99x16xf32>
    %101 = tpu.iota {dimensions = array<i32: 0>} : vector<99x16xi32>
    %102 = tpu.iota {dimensions = array<i32: 1>} : vector<99x16xi32>
    %c6_i32_36 = arith.constant 6 : i32
    %103 = vector.broadcast %c6_i32_36 : i32 to vector<99x16xi32>
    %104 = arith.muli %103, %102 : vector<99x16xi32>
    %c8_i32 = arith.constant 8 : i32
    %105 = vector.broadcast %c8_i32 : i32 to vector<99x16xi32>
    %106 = arith.addi %104, %105 : vector<99x16xi32>
    %107 = arith.cmpi eq, %101, %106 : vector<99x16xi32>
    %108 = arith.extui %107 : vector<99x16xi1> to vector<99x16xi32>
    %109 = arith.sitofp %108 : vector<99x16xi32> to vector<99x16xf32>
    %cst_37 = arith.constant dense<0.000000e+00> : vector<8x16xf32>
    %110 = tpu.matmul %22, %64, %cst_37 {dimension_numbers = #tpu.dot_dimension_numbers<[1], [0], [0], [1], [0, 0, 1, 1], [], []>} : vector<8x99xf32>, vector<99x16xf32>, vector<8x16xf32> -> vector<8x16xf32>
    %cst_38 = arith.constant dense<0.000000e+00> : vector<8x16xf32>
    %111 = tpu.matmul %22, %73, %cst_38 {dimension_numbers = #tpu.dot_dimension_numbers<[1], [0], [0], [1], [0, 0, 1, 1], [], []>} : vector<8x99xf32>, vector<99x16xf32>, vector<8x16xf32> -> vector<8x16xf32>
    %cst_39 = arith.constant dense<0.000000e+00> : vector<8x16xf32>
    %112 = tpu.matmul %22, %82, %cst_39 {dimension_numbers = #tpu.dot_dimension_numbers<[1], [0], [0], [1], [0, 0, 1, 1], [], []>} : vector<8x99xf32>, vector<99x16xf32>, vector<8x16xf32> -> vector<8x16xf32>
    %cst_40 = arith.constant dense<0.000000e+00> : vector<8x16xf32>
    %113 = tpu.matmul %22, %91, %cst_40 {dimension_numbers = #tpu.dot_dimension_numbers<[1], [0], [0], [1], [0, 0, 1, 1], [], []>} : vector<8x99xf32>, vector<99x16xf32>, vector<8x16xf32> -> vector<8x16xf32>
    %cst_41 = arith.constant dense<0.000000e+00> : vector<8x16xf32>
    %114 = tpu.matmul %22, %100, %cst_41 {dimension_numbers = #tpu.dot_dimension_numbers<[1], [0], [0], [1], [0, 0, 1, 1], [], []>} : vector<8x99xf32>, vector<99x16xf32>, vector<8x16xf32> -> vector<8x16xf32>
    %cst_42 = arith.constant dense<0.000000e+00> : vector<8x16xf32>
    %115 = tpu.matmul %22, %109, %cst_42 {dimension_numbers = #tpu.dot_dimension_numbers<[1], [0], [0], [1], [0, 0, 1, 1], [], []>} : vector<8x99xf32>, vector<99x16xf32>, vector<8x16xf32> -> vector<8x16xf32>
    %116 = tpu.iota {dimensions = array<i32: 0>} : vector<51x3xi32>
    %117 = tpu.iota {dimensions = array<i32: 1>} : vector<51x3xi32>
    %c1_i32 = arith.constant 1 : i32
    %118 = vector.broadcast %c1_i32 : i32 to vector<51x3xi32>
    %119 = arith.muli %118, %117 : vector<51x3xi32>
    %c0_i32 = arith.constant 0 : i32
    %120 = vector.broadcast %c0_i32 : i32 to vector<51x3xi32>
    %121 = arith.addi %119, %120 : vector<51x3xi32>
    %122 = arith.cmpi eq, %116, %121 : vector<51x3xi32>
    %123 = arith.extui %122 : vector<51x3xi1> to vector<51x3xi32>
    %124 = arith.sitofp %123 : vector<51x3xi32> to vector<51x3xf32>
    %125 = tpu.iota {dimensions = array<i32: 0>} : vector<99x3xi32>
    %126 = tpu.iota {dimensions = array<i32: 1>} : vector<99x3xi32>
    %c1_i32_43 = arith.constant 1 : i32
    %127 = vector.broadcast %c1_i32_43 : i32 to vector<99x3xi32>
    %128 = arith.muli %127, %126 : vector<99x3xi32>
    %c0_i32_44 = arith.constant 0 : i32
    %129 = vector.broadcast %c0_i32_44 : i32 to vector<99x3xi32>
    %130 = arith.addi %128, %129 : vector<99x3xi32>
    %131 = arith.cmpi eq, %125, %130 : vector<99x3xi32>
    %132 = arith.extui %131 : vector<99x3xi1> to vector<99x3xi32>
    %133 = arith.sitofp %132 : vector<99x3xi32> to vector<99x3xf32>
    %cst_45 = arith.constant dense<0.000000e+00> : vector<8x3xf32>
    %134 = tpu.matmul %0, %124, %cst_45 {dimension_numbers = #tpu.dot_dimension_numbers<[1], [0], [0], [1], [0, 0, 1, 1], [], []>} : vector<8x51xf32>, vector<51x3xf32>, vector<8x3xf32> -> vector<8x3xf32>
    %cst_46 = arith.constant dense<0.000000e+00> : vector<8x3xf32>
    %135 = tpu.matmul %1, %124, %cst_46 {dimension_numbers = #tpu.dot_dimension_numbers<[1], [0], [0], [1], [0, 0, 1, 1], [], []>} : vector<8x51xf32>, vector<51x3xf32>, vector<8x3xf32> -> vector<8x3xf32>
    %cst_47 = arith.constant dense<0.000000e+00> : vector<8x3xf32>
    %136 = tpu.matmul %22, %133, %cst_47 {dimension_numbers = #tpu.dot_dimension_numbers<[1], [0], [0], [1], [0, 0, 1, 1], [], []>} : vector<8x99xf32>, vector<99x3xf32>, vector<8x3xf32> -> vector<8x3xf32>
    %137 = arith.mulf %50, %50 : vector<8x16xf32>
    %138 = arith.mulf %51, %51 : vector<8x16xf32>
    %139 = arith.addf %137, %138 : vector<8x16xf32>
    %140 = arith.mulf %52, %52 : vector<8x16xf32>
    %141 = arith.addf %139, %140 : vector<8x16xf32>
    %cst_48 = arith.constant 1.000000e-16 : f32
    %142 = vector.broadcast %cst_48 : f32 to vector<8x16xf32>
    %143 = arith.maximumf %141, %142 : vector<8x16xf32>
    %144 = math.rsqrt %143 : vector<8x16xf32>
    %145 = arith.mulf %143, %144 : vector<8x16xf32>
    %146 = arith.mulf %50, %144 : vector<8x16xf32>
    %147 = arith.mulf %51, %144 : vector<8x16xf32>
    %148 = arith.mulf %52, %144 : vector<8x16xf32>
    %149 = math.sin %145 : vector<8x16xf32>
    %150 = math.cos %145 : vector<8x16xf32>
    %151 = arith.mulf %146, %149 : vector<8x16xf32>
    %152 = arith.mulf %147, %149 : vector<8x16xf32>
    %153 = arith.mulf %148, %149 : vector<8x16xf32>
    %154 = arith.mulf %151, %151 : vector<8x16xf32>
    %155 = arith.mulf %152, %152 : vector<8x16xf32>
    %156 = arith.mulf %153, %153 : vector<8x16xf32>
    %157 = arith.mulf %151, %152 : vector<8x16xf32>
    %158 = arith.mulf %151, %153 : vector<8x16xf32>
    %159 = arith.mulf %152, %153 : vector<8x16xf32>
    %160 = arith.mulf %151, %150 : vector<8x16xf32>
    %161 = arith.mulf %152, %150 : vector<8x16xf32>
    %162 = arith.mulf %153, %150 : vector<8x16xf32>
    %cst_49 = arith.constant 2.000000e+00 : f32
    %163 = vector.broadcast %cst_49 : f32 to vector<8x16xf32>
    %164 = arith.mulf %163, %155 : vector<8x16xf32>
    %cst_50 = arith.constant 1.000000e+00 : f32
    %165 = vector.broadcast %cst_50 : f32 to vector<8x16xf32>
    %166 = arith.subf %165, %164 : vector<8x16xf32>
    %cst_51 = arith.constant 2.000000e+00 : f32
    %167 = vector.broadcast %cst_51 : f32 to vector<8x16xf32>
    %168 = arith.mulf %167, %156 : vector<8x16xf32>
    %169 = arith.subf %166, %168 : vector<8x16xf32>
    %cst_52 = arith.constant 2.000000e+00 : f32
    %170 = vector.broadcast %cst_52 : f32 to vector<8x16xf32>
    %171 = arith.mulf %170, %157 : vector<8x16xf32>
    %cst_53 = arith.constant 2.000000e+00 : f32
    %172 = vector.broadcast %cst_53 : f32 to vector<8x16xf32>
    %173 = arith.mulf %172, %162 : vector<8x16xf32>
    %174 = arith.subf %171, %173 : vector<8x16xf32>
    %cst_54 = arith.constant 2.000000e+00 : f32
    %175 = vector.broadcast %cst_54 : f32 to vector<8x16xf32>
    %176 = arith.mulf %175, %158 : vector<8x16xf32>
    %cst_55 = arith.constant 2.000000e+00 : f32
    %177 = vector.broadcast %cst_55 : f32 to vector<8x16xf32>
    %178 = arith.mulf %177, %161 : vector<8x16xf32>
    %179 = arith.addf %176, %178 : vector<8x16xf32>
    %cst_56 = arith.constant 2.000000e+00 : f32
    %180 = vector.broadcast %cst_56 : f32 to vector<8x16xf32>
    %181 = arith.mulf %180, %157 : vector<8x16xf32>
    %cst_57 = arith.constant 2.000000e+00 : f32
    %182 = vector.broadcast %cst_57 : f32 to vector<8x16xf32>
    %183 = arith.mulf %182, %162 : vector<8x16xf32>
    %184 = arith.addf %181, %183 : vector<8x16xf32>
    %cst_58 = arith.constant 2.000000e+00 : f32
    %185 = vector.broadcast %cst_58 : f32 to vector<8x16xf32>
    %186 = arith.mulf %185, %154 : vector<8x16xf32>
    %cst_59 = arith.constant 1.000000e+00 : f32
    %187 = vector.broadcast %cst_59 : f32 to vector<8x16xf32>
    %188 = arith.subf %187, %186 : vector<8x16xf32>
    %cst_60 = arith.constant 2.000000e+00 : f32
    %189 = vector.broadcast %cst_60 : f32 to vector<8x16xf32>
    %190 = arith.mulf %189, %156 : vector<8x16xf32>
    %191 = arith.subf %188, %190 : vector<8x16xf32>
    %cst_61 = arith.constant 2.000000e+00 : f32
    %192 = vector.broadcast %cst_61 : f32 to vector<8x16xf32>
    %193 = arith.mulf %192, %159 : vector<8x16xf32>
    %cst_62 = arith.constant 2.000000e+00 : f32
    %194 = vector.broadcast %cst_62 : f32 to vector<8x16xf32>
    %195 = arith.mulf %194, %160 : vector<8x16xf32>
    %196 = arith.subf %193, %195 : vector<8x16xf32>
    %cst_63 = arith.constant 2.000000e+00 : f32
    %197 = vector.broadcast %cst_63 : f32 to vector<8x16xf32>
    %198 = arith.mulf %197, %158 : vector<8x16xf32>
    %cst_64 = arith.constant 2.000000e+00 : f32
    %199 = vector.broadcast %cst_64 : f32 to vector<8x16xf32>
    %200 = arith.mulf %199, %161 : vector<8x16xf32>
    %201 = arith.subf %198, %200 : vector<8x16xf32>
    %cst_65 = arith.constant 2.000000e+00 : f32
    %202 = vector.broadcast %cst_65 : f32 to vector<8x16xf32>
    %203 = arith.mulf %202, %159 : vector<8x16xf32>
    %cst_66 = arith.constant 2.000000e+00 : f32
    %204 = vector.broadcast %cst_66 : f32 to vector<8x16xf32>
    %205 = arith.mulf %204, %160 : vector<8x16xf32>
    %206 = arith.addf %203, %205 : vector<8x16xf32>
    %cst_67 = arith.constant 2.000000e+00 : f32
    %207 = vector.broadcast %cst_67 : f32 to vector<8x16xf32>
    %208 = arith.mulf %207, %154 : vector<8x16xf32>
    %cst_68 = arith.constant 1.000000e+00 : f32
    %209 = vector.broadcast %cst_68 : f32 to vector<8x16xf32>
    %210 = arith.subf %209, %208 : vector<8x16xf32>
    %cst_69 = arith.constant 2.000000e+00 : f32
    %211 = vector.broadcast %cst_69 : f32 to vector<8x16xf32>
    %212 = arith.mulf %211, %155 : vector<8x16xf32>
    %213 = arith.subf %210, %212 : vector<8x16xf32>
    %214 = arith.mulf %53, %53 : vector<8x16xf32>
    %215 = arith.mulf %54, %54 : vector<8x16xf32>
    %216 = arith.addf %214, %215 : vector<8x16xf32>
    %217 = arith.mulf %55, %55 : vector<8x16xf32>
    %218 = arith.addf %216, %217 : vector<8x16xf32>
    %cst_70 = arith.constant 1.000000e-16 : f32
    %219 = vector.broadcast %cst_70 : f32 to vector<8x16xf32>
    %220 = arith.maximumf %218, %219 : vector<8x16xf32>
    %221 = math.rsqrt %220 : vector<8x16xf32>
    %222 = arith.mulf %220, %221 : vector<8x16xf32>
    %223 = arith.mulf %53, %221 : vector<8x16xf32>
    %224 = arith.mulf %54, %221 : vector<8x16xf32>
    %225 = arith.mulf %55, %221 : vector<8x16xf32>
    %226 = math.sin %222 : vector<8x16xf32>
    %227 = math.cos %222 : vector<8x16xf32>
    %228 = arith.mulf %223, %226 : vector<8x16xf32>
    %229 = arith.mulf %224, %226 : vector<8x16xf32>
    %230 = arith.mulf %225, %226 : vector<8x16xf32>
    %231 = arith.mulf %228, %228 : vector<8x16xf32>
    %232 = arith.mulf %229, %229 : vector<8x16xf32>
    %233 = arith.mulf %230, %230 : vector<8x16xf32>
    %234 = arith.mulf %228, %229 : vector<8x16xf32>
    %235 = arith.mulf %228, %230 : vector<8x16xf32>
    %236 = arith.mulf %229, %230 : vector<8x16xf32>
    %237 = arith.mulf %228, %227 : vector<8x16xf32>
    %238 = arith.mulf %229, %227 : vector<8x16xf32>
    %239 = arith.mulf %230, %227 : vector<8x16xf32>
    %cst_71 = arith.constant 2.000000e+00 : f32
    %240 = vector.broadcast %cst_71 : f32 to vector<8x16xf32>
    %241 = arith.mulf %240, %232 : vector<8x16xf32>
    %cst_72 = arith.constant 1.000000e+00 : f32
    %242 = vector.broadcast %cst_72 : f32 to vector<8x16xf32>
    %243 = arith.subf %242, %241 : vector<8x16xf32>
    %cst_73 = arith.constant 2.000000e+00 : f32
    %244 = vector.broadcast %cst_73 : f32 to vector<8x16xf32>
    %245 = arith.mulf %244, %233 : vector<8x16xf32>
    %246 = arith.subf %243, %245 : vector<8x16xf32>
    %cst_74 = arith.constant 2.000000e+00 : f32
    %247 = vector.broadcast %cst_74 : f32 to vector<8x16xf32>
    %248 = arith.mulf %247, %234 : vector<8x16xf32>
    %cst_75 = arith.constant 2.000000e+00 : f32
    %249 = vector.broadcast %cst_75 : f32 to vector<8x16xf32>
    %250 = arith.mulf %249, %239 : vector<8x16xf32>
    %251 = arith.subf %248, %250 : vector<8x16xf32>
    %cst_76 = arith.constant 2.000000e+00 : f32
    %252 = vector.broadcast %cst_76 : f32 to vector<8x16xf32>
    %253 = arith.mulf %252, %235 : vector<8x16xf32>
    %cst_77 = arith.constant 2.000000e+00 : f32
    %254 = vector.broadcast %cst_77 : f32 to vector<8x16xf32>
    %255 = arith.mulf %254, %238 : vector<8x16xf32>
    %256 = arith.addf %253, %255 : vector<8x16xf32>
    %cst_78 = arith.constant 2.000000e+00 : f32
    %257 = vector.broadcast %cst_78 : f32 to vector<8x16xf32>
    %258 = arith.mulf %257, %234 : vector<8x16xf32>
    %cst_79 = arith.constant 2.000000e+00 : f32
    %259 = vector.broadcast %cst_79 : f32 to vector<8x16xf32>
    %260 = arith.mulf %259, %239 : vector<8x16xf32>
    %261 = arith.addf %258, %260 : vector<8x16xf32>
    %cst_80 = arith.constant 2.000000e+00 : f32
    %262 = vector.broadcast %cst_80 : f32 to vector<8x16xf32>
    %263 = arith.mulf %262, %231 : vector<8x16xf32>
    %cst_81 = arith.constant 1.000000e+00 : f32
    %264 = vector.broadcast %cst_81 : f32 to vector<8x16xf32>
    %265 = arith.subf %264, %263 : vector<8x16xf32>
    %cst_82 = arith.constant 2.000000e+00 : f32
    %266 = vector.broadcast %cst_82 : f32 to vector<8x16xf32>
    %267 = arith.mulf %266, %233 : vector<8x16xf32>
    %268 = arith.subf %265, %267 : vector<8x16xf32>
    %cst_83 = arith.constant 2.000000e+00 : f32
    %269 = vector.broadcast %cst_83 : f32 to vector<8x16xf32>
    %270 = arith.mulf %269, %236 : vector<8x16xf32>
    %cst_84 = arith.constant 2.000000e+00 : f32
    %271 = vector.broadcast %cst_84 : f32 to vector<8x16xf32>
    %272 = arith.mulf %271, %237 : vector<8x16xf32>
    %273 = arith.subf %270, %272 : vector<8x16xf32>
    %cst_85 = arith.constant 2.000000e+00 : f32
    %274 = vector.broadcast %cst_85 : f32 to vector<8x16xf32>
    %275 = arith.mulf %274, %235 : vector<8x16xf32>
    %cst_86 = arith.constant 2.000000e+00 : f32
    %276 = vector.broadcast %cst_86 : f32 to vector<8x16xf32>
    %277 = arith.mulf %276, %238 : vector<8x16xf32>
    %278 = arith.subf %275, %277 : vector<8x16xf32>
    %cst_87 = arith.constant 2.000000e+00 : f32
    %279 = vector.broadcast %cst_87 : f32 to vector<8x16xf32>
    %280 = arith.mulf %279, %236 : vector<8x16xf32>
    %cst_88 = arith.constant 2.000000e+00 : f32
    %281 = vector.broadcast %cst_88 : f32 to vector<8x16xf32>
    %282 = arith.mulf %281, %237 : vector<8x16xf32>
    %283 = arith.addf %280, %282 : vector<8x16xf32>
    %cst_89 = arith.constant 2.000000e+00 : f32
    %284 = vector.broadcast %cst_89 : f32 to vector<8x16xf32>
    %285 = arith.mulf %284, %231 : vector<8x16xf32>
    %cst_90 = arith.constant 1.000000e+00 : f32
    %286 = vector.broadcast %cst_90 : f32 to vector<8x16xf32>
    %287 = arith.subf %286, %285 : vector<8x16xf32>
    %cst_91 = arith.constant 2.000000e+00 : f32
    %288 = vector.broadcast %cst_91 : f32 to vector<8x16xf32>
    %289 = arith.mulf %288, %232 : vector<8x16xf32>
    %290 = arith.subf %287, %289 : vector<8x16xf32>
    %291 = arith.mulf %110, %110 : vector<8x16xf32>
    %292 = arith.mulf %111, %111 : vector<8x16xf32>
    %293 = arith.addf %291, %292 : vector<8x16xf32>
    %294 = arith.mulf %112, %112 : vector<8x16xf32>
    %295 = arith.addf %293, %294 : vector<8x16xf32>
    %cst_92 = arith.constant 1.000000e-16 : f32
    %296 = vector.broadcast %cst_92 : f32 to vector<8x16xf32>
    %297 = arith.maximumf %295, %296 : vector<8x16xf32>
    %298 = math.rsqrt %297 : vector<8x16xf32>
    %299 = arith.mulf %110, %298 : vector<8x16xf32>
    %300 = arith.mulf %111, %298 : vector<8x16xf32>
    %301 = arith.mulf %112, %298 : vector<8x16xf32>
    %302 = arith.mulf %300, %115 : vector<8x16xf32>
    %303 = arith.mulf %301, %114 : vector<8x16xf32>
    %304 = arith.subf %302, %303 : vector<8x16xf32>
    %305 = arith.mulf %301, %113 : vector<8x16xf32>
    %306 = arith.mulf %299, %115 : vector<8x16xf32>
    %307 = arith.subf %305, %306 : vector<8x16xf32>
    %308 = arith.mulf %299, %114 : vector<8x16xf32>
    %309 = arith.mulf %300, %113 : vector<8x16xf32>
    %310 = arith.subf %308, %309 : vector<8x16xf32>
    %311 = arith.mulf %304, %304 : vector<8x16xf32>
    %312 = arith.mulf %307, %307 : vector<8x16xf32>
    %313 = arith.addf %311, %312 : vector<8x16xf32>
    %314 = arith.mulf %310, %310 : vector<8x16xf32>
    %315 = arith.addf %313, %314 : vector<8x16xf32>
    %cst_93 = arith.constant 1.000000e-16 : f32
    %316 = vector.broadcast %cst_93 : f32 to vector<8x16xf32>
    %317 = arith.maximumf %315, %316 : vector<8x16xf32>
    %318 = math.rsqrt %317 : vector<8x16xf32>
    %319 = arith.mulf %304, %318 : vector<8x16xf32>
    %320 = arith.mulf %307, %318 : vector<8x16xf32>
    %321 = arith.mulf %310, %318 : vector<8x16xf32>
    %322 = arith.mulf %320, %301 : vector<8x16xf32>
    %323 = arith.mulf %321, %300 : vector<8x16xf32>
    %324 = arith.subf %322, %323 : vector<8x16xf32>
    %325 = arith.mulf %321, %299 : vector<8x16xf32>
    %326 = arith.mulf %319, %301 : vector<8x16xf32>
    %327 = arith.subf %325, %326 : vector<8x16xf32>
    %328 = arith.mulf %319, %300 : vector<8x16xf32>
    %329 = arith.mulf %320, %299 : vector<8x16xf32>
    %330 = arith.subf %328, %329 : vector<8x16xf32>
    %331 = arith.mulf %169, %299 : vector<8x16xf32>
    %332 = arith.mulf %174, %300 : vector<8x16xf32>
    %333 = arith.addf %331, %332 : vector<8x16xf32>
    %334 = arith.mulf %179, %301 : vector<8x16xf32>
    %335 = arith.addf %333, %334 : vector<8x16xf32>
    %336 = arith.subf %335, %246 : vector<8x16xf32>
    %337 = arith.mulf %336, %336 : vector<8x16xf32>
    %338 = arith.mulf %169, %324 : vector<8x16xf32>
    %339 = arith.mulf %174, %327 : vector<8x16xf32>
    %340 = arith.addf %338, %339 : vector<8x16xf32>
    %341 = arith.mulf %179, %330 : vector<8x16xf32>
    %342 = arith.addf %340, %341 : vector<8x16xf32>
    %343 = arith.subf %342, %251 : vector<8x16xf32>
    %344 = arith.mulf %343, %343 : vector<8x16xf32>
    %345 = arith.addf %337, %344 : vector<8x16xf32>
    %346 = arith.mulf %169, %319 : vector<8x16xf32>
    %347 = arith.mulf %174, %320 : vector<8x16xf32>
    %348 = arith.addf %346, %347 : vector<8x16xf32>
    %349 = arith.mulf %179, %321 : vector<8x16xf32>
    %350 = arith.addf %348, %349 : vector<8x16xf32>
    %351 = arith.subf %350, %256 : vector<8x16xf32>
    %352 = arith.mulf %351, %351 : vector<8x16xf32>
    %353 = arith.addf %345, %352 : vector<8x16xf32>
    %354 = arith.mulf %184, %299 : vector<8x16xf32>
    %355 = arith.mulf %191, %300 : vector<8x16xf32>
    %356 = arith.addf %354, %355 : vector<8x16xf32>
    %357 = arith.mulf %196, %301 : vector<8x16xf32>
    %358 = arith.addf %356, %357 : vector<8x16xf32>
    %359 = arith.subf %358, %261 : vector<8x16xf32>
    %360 = arith.mulf %359, %359 : vector<8x16xf32>
    %361 = arith.addf %353, %360 : vector<8x16xf32>
    %362 = arith.mulf %184, %324 : vector<8x16xf32>
    %363 = arith.mulf %191, %327 : vector<8x16xf32>
    %364 = arith.addf %362, %363 : vector<8x16xf32>
    %365 = arith.mulf %196, %330 : vector<8x16xf32>
    %366 = arith.addf %364, %365 : vector<8x16xf32>
    %367 = arith.subf %366, %268 : vector<8x16xf32>
    %368 = arith.mulf %367, %367 : vector<8x16xf32>
    %369 = arith.addf %361, %368 : vector<8x16xf32>
    %370 = arith.mulf %184, %319 : vector<8x16xf32>
    %371 = arith.mulf %191, %320 : vector<8x16xf32>
    %372 = arith.addf %370, %371 : vector<8x16xf32>
    %373 = arith.mulf %196, %321 : vector<8x16xf32>
    %374 = arith.addf %372, %373 : vector<8x16xf32>
    %375 = arith.subf %374, %273 : vector<8x16xf32>
    %376 = arith.mulf %375, %375 : vector<8x16xf32>
    %377 = arith.addf %369, %376 : vector<8x16xf32>
    %378 = arith.mulf %201, %299 : vector<8x16xf32>
    %379 = arith.mulf %206, %300 : vector<8x16xf32>
    %380 = arith.addf %378, %379 : vector<8x16xf32>
    %381 = arith.mulf %213, %301 : vector<8x16xf32>
    %382 = arith.addf %380, %381 : vector<8x16xf32>
    %383 = arith.subf %382, %278 : vector<8x16xf32>
    %384 = arith.mulf %383, %383 : vector<8x16xf32>
    %385 = arith.addf %377, %384 : vector<8x16xf32>
    %386 = arith.mulf %201, %324 : vector<8x16xf32>
    %387 = arith.mulf %206, %327 : vector<8x16xf32>
    %388 = arith.addf %386, %387 : vector<8x16xf32>
    %389 = arith.mulf %213, %330 : vector<8x16xf32>
    %390 = arith.addf %388, %389 : vector<8x16xf32>
    %391 = arith.subf %390, %283 : vector<8x16xf32>
    %392 = arith.mulf %391, %391 : vector<8x16xf32>
    %393 = arith.addf %385, %392 : vector<8x16xf32>
    %394 = arith.mulf %201, %319 : vector<8x16xf32>
    %395 = arith.mulf %206, %320 : vector<8x16xf32>
    %396 = arith.addf %394, %395 : vector<8x16xf32>
    %397 = arith.mulf %213, %321 : vector<8x16xf32>
    %398 = arith.addf %396, %397 : vector<8x16xf32>
    %399 = arith.subf %398, %290 : vector<8x16xf32>
    %400 = arith.mulf %399, %399 : vector<8x16xf32>
    %401 = arith.addf %393, %400 : vector<8x16xf32>
    %cst_94 = arith.constant dense<0.000000e+00> : vector<8xf32>
    %402 = vector.multi_reduction <add>, %401, %cst_94 [1] : vector<8x16xf32> to vector<8xf32>
    %403 = vector.shape_cast %402 : vector<8xf32> to vector<8x1xf32>
    %cst_95 = arith.constant dense<0.000000e+00> : vector<1xf32>
    %404 = vector.multi_reduction <add>, %403, %cst_95 [0] : vector<8x1xf32> to vector<1xf32>
    %405 = vector.shape_cast %404 : vector<1xf32> to vector<1x1xf32>
    %cst_96 = arith.constant 8.68055562E-4 : f32
    %406 = vector.broadcast %cst_96 : f32 to vector<1x1xf32>
    %407 = arith.mulf %405, %406 : vector<1x1xf32>
    %408 = arith.addf %134, %136 : vector<8x3xf32>
    %409 = arith.subf %408, %135 : vector<8x3xf32>
    %410 = arith.mulf %409, %409 : vector<8x3xf32>
    %cst_97 = arith.constant dense<0.000000e+00> : vector<8xf32>
    %411 = vector.multi_reduction <add>, %410, %cst_97 [1] : vector<8x3xf32> to vector<8xf32>
    %412 = vector.shape_cast %411 : vector<8xf32> to vector<8x1xf32>
    %cst_98 = arith.constant dense<0.000000e+00> : vector<1xf32>
    %413 = vector.multi_reduction <add>, %412, %cst_98 [0] : vector<8x1xf32> to vector<1xf32>
    %414 = vector.shape_cast %413 : vector<1xf32> to vector<1x1xf32>
    %cst_99 = arith.constant 0.0416666679 : f32
    %415 = vector.broadcast %cst_99 : f32 to vector<1x1xf32>
    %416 = arith.mulf %414, %415 : vector<1x1xf32>
    %cst_100 = arith.constant 0.000000e+00 : f32
    %417 = vector.broadcast %cst_100 : f32 to vector<1x1xf32>
    %418 = arith.mulf %2, %2 : vector<51x32xf32>
    %cst_101 = arith.constant dense<0.000000e+00> : vector<51xf32>
    %419 = vector.multi_reduction <add>, %418, %cst_101 [1] : vector<51x32xf32> to vector<51xf32>
    %420 = vector.shape_cast %419 : vector<51xf32> to vector<51x1xf32>
    %cst_102 = arith.constant dense<0.000000e+00> : vector<1xf32>
    %421 = vector.multi_reduction <add>, %420, %cst_102 [0] : vector<51x1xf32> to vector<1xf32>
    %422 = vector.shape_cast %421 : vector<1xf32> to vector<1x1xf32>
    %423 = math.sqrt %422 : vector<1x1xf32>
    %424 = arith.addf %417, %423 : vector<1x1xf32>
    %425 = arith.mulf %10, %10 : vector<32x32xf32>
    %cst_103 = arith.constant dense<0.000000e+00> : vector<32xf32>
    %426 = vector.multi_reduction <add>, %425, %cst_103 [1] : vector<32x32xf32> to vector<32xf32>
    %427 = vector.shape_cast %426 : vector<32xf32> to vector<32x1xf32>
    %cst_104 = arith.constant dense<0.000000e+00> : vector<1xf32>
    %428 = vector.multi_reduction <add>, %427, %cst_104 [0] : vector<32x1xf32> to vector<1xf32>
    %429 = vector.shape_cast %428 : vector<1xf32> to vector<1x1xf32>
    %430 = math.sqrt %429 : vector<1x1xf32>
    %431 = arith.addf %424, %430 : vector<1x1xf32>
    %432 = arith.mulf %18, %18 : vector<32x99xf32>
    %cst_105 = arith.constant dense<0.000000e+00> : vector<32xf32>
    %433 = vector.multi_reduction <add>, %432, %cst_105 [1] : vector<32x99xf32> to vector<32xf32>
    %434 = vector.shape_cast %433 : vector<32xf32> to vector<32x1xf32>
    %cst_106 = arith.constant dense<0.000000e+00> : vector<1xf32>
    %435 = vector.multi_reduction <add>, %434, %cst_106 [0] : vector<32x1xf32> to vector<1xf32>
    %436 = vector.shape_cast %435 : vector<1xf32> to vector<1x1xf32>
    %437 = math.sqrt %436 : vector<1x1xf32>
    %438 = arith.addf %431, %437 : vector<1x1xf32>
    %439 = arith.addf %407, %416 : vector<1x1xf32>
    %cst_107 = arith.constant 1.000000e-03 : f32
    %440 = vector.broadcast %cst_107 : f32 to vector<1x1xf32>
    %441 = arith.mulf %438, %440 : vector<1x1xf32>
    %442 = arith.addf %439, %441 : vector<1x1xf32>
    %c0_108 = arith.constant 0 : index
    %c0_109 = arith.constant 0 : index
    %443 = vector.load %arg9[%c0_108, %c0_109] : memref<1x1xf32, #tpu.memory_space<vmem>>, vector<1x1xf32>
    tpu.vector_store %arg9[%c0_108, %c0_109], %442 {strides = array<i32>} : memref<1x1xf32, #tpu.memory_space<vmem>>, vector<1x1xf32>,
    return
  }
  func.func @transform_0(%arg0: i32) -> (i32, i32) {
    %c0_i32 = arith.constant 0 : i32
    %c0_i32_0 = arith.constant 0 : i32
    %c0_i32_1 = arith.constant 0 : i32
    return %c0_i32, %c0_i32_0 : i32, i32
  }
  func.func @transform_1(%arg0: i32) -> (i32, i32) {
    %c0_i32 = arith.constant 0 : i32
    %c0_i32_0 = arith.constant 0 : i32
    %c0_i32_1 = arith.constant 0 : i32
    return %c0_i32, %c0_i32_0 : i32, i32
  }
  func.func @transform_2(%arg0: i32) -> (i32, i32) {
    %c0_i32 = arith.constant 0 : i32
    %c0_i32_0 = arith.constant 0 : i32
    %c0_i32_1 = arith.constant 0 : i32
    return %c0_i32, %c0_i32_0 : i32, i32
  }
  func.func @transform_3(%arg0: i32) -> (i32, i32) {
    %c0_i32 = arith.constant 0 : i32
    %c0_i32_0 = arith.constant 0 : i32
    %c0_i32_1 = arith.constant 0 : i32
    return %c0_i32, %c0_i32_0 : i32, i32
  }
  func.func @transform_4(%arg0: i32) -> (i32, i32) {
    %c0_i32 = arith.constant 0 : i32
    %c0_i32_0 = arith.constant 0 : i32
    %c0_i32_1 = arith.constant 0 : i32
    return %c0_i32, %c0_i32_0 : i32, i32
  }
  func.func @transform_5(%arg0: i32) -> (i32, i32) {
    %c0_i32 = arith.constant 0 : i32
    %c0_i32_0 = arith.constant 0 : i32
    %c0_i32_1 = arith.constant 0 : i32
    return %c0_i32, %c0_i32_0 : i32, i32
  }
  func.func @transform_6(%arg0: i32) -> (i32, i32) {
    %c0_i32 = arith.constant 0 : i32
    %c0_i32_0 = arith.constant 0 : i32
    %c0_i32_1 = arith.constant 0 : i32
    return %c0_i32, %c0_i32_0 : i32, i32
  }
  func.func @transform_7(%arg0: i32) -> (i32, i32) {
    %c0_i32 = arith.constant 0 : i32
    %c0_i32_0 = arith.constant 0 : i32
    %c0_i32_1 = arith.constant 0 : i32
    return %c0_i32, %c0_i32_0 : i32, i32
  }
  func.func @transform_8(%arg0: i32) -> (i32, i32) {
    %c0_i32 = arith.constant 0 : i32
    %c0_i32_0 = arith.constant 0 : i32
    %c0_i32_1 = arith.constant 0 : i32
    return %c0_i32, %c0_i32_0 : i32, i32
  }
}

</mosaic_0001>

<bundles_post_ra>
// kernel: tpu_custom_call.1
= control target key start
LH: loop header
LB: loop body
LE: loop exit
PB: predicated region body
PF: predicated region fallthrough
CT: control target
= control target key end

     0   :  { %v3676_v3 = vmov 0.0|0.0   ;;  %vm4858_vm0 = vmmov 0   ;;  %v3678_v6 = vmov 0.0   ;;  %s4848_s0 = inlined_call_operand.vmem [shape: f32[8,51], index: 0, kind: input, shape index: {}]   ;;  %s4849_s1 = inlined_call_operand.vmem [shape: f32[8,51], index: 1, kind: input, shape index: {}]   ;;  %s4850_s2 = inlined_call_operand.vmem [shape: f32[51,32], index: 2, kind: input, shape index: {}]   ;;  %s4851_s3 = inlined_call_operand.vmem [shape: f32[1,32], index: 3, kind: input, shape index: {}]   ;;  %s4852_s4 = inlined_call_operand.vmem [shape: f32[32,32], index: 4, kind: input, shape index: {}]   ;;  %s4853_s5 = inlined_call_operand.vmem [shape: f32[1,32], index: 5, kind: input, shape index: {}]   ;;  %s4854_s6 = inlined_call_operand.vmem [shape: f32[32,99], index: 6, kind: input, shape index: {}]   ;;  %s4855_s7 = inlined_call_operand.vmem [shape: f32[1,99], index: 7, kind: input, shape index: {}]   ;;  %s4856_s8 = inlined_call_operand.hbm [shape: f32[1,1], index: 8, kind: output, shape index: {}]  }
   0x1   :  { %v32_v0 = vld [vmem:[%s4850_s2] sm:$0xff]  ;;  %v33_v1 = vld [vmem:[%s4850_s2 + $0x8] sm:$0xff]  ;;  %v34_v2 = vld [vmem:[%s4850_s2 + $0x10] sm:$0xff]  ;;  %3373 = vmatprep.subr.bf16.mxu0 %v3676_v3  ;;  %3382 = vmatprep.subr.bf16.mxu1 %v3676_v3 }
   0x2   :  { %v3374_v4 = vpack.c.bf16 %v33_v1, %v32_v0  ;;  %v35_v5 = vld [vmem:[%s4850_s2 + $0x18] sm:$0xff]  ;;  %3009 = vmatprep.mubr.msk.f32.mxu0 %vm4858_vm0, %v3678_v6  ;;  %3020 = vmatprep.mubr.msk.f32.mxu1 %vm4858_vm0, %v3678_v6 }
   0x3   :  { %v3377_v7 = vpack.c.bf16 %v35_v5, %v34_v2 }
   0x4   :  { %3375 = vmatpush3.bf16.msra.mxu0 %v3374_v4 }
   0x5   :  { %13 = vsyncpa [#allocation3], 0  ;;  %3376 = vmatprep.subr.bf16.mxu0 %v3676_v3  ;;  %v36_v8 = vld [vmem:[%s4850_s2 + $0x20] sm:$0xff]  ;;  %v37_v9 = vld [vmem:[%s4850_s2 + $0x28] sm:$0xff]  ;;  %vm4862_vm1 = vcmask 1042432   ;;  %vm4860_vm2 = vcmask 416768   ;;  %v297_v31 = vlaneseq }
   0x6   :  { %v3380_v10 = vpack.c.bf16 %v37_v9, %v36_v8  ;;  %v38_v11 = vld [vmem:[%s4850_s2 + $0x30] sm:$0x7]  ;;  %v3765_v12 = vld [vmem:[%s4848_s0] sm:$0xff]  ;;  %v127_v14 = vld [vmem:[%s4852_s4 + $0x8] sm:$0xff]  ;;  %vm4857_vm3 = vcmask 261120  }
   0x7   :  { %v126_v13 = vld [vmem:[%s4852_s4] sm:$0xff]  ;;  %v128_v16 = vld [vmem:[%s4852_s4 + $0x10] sm:$0xff]  ;;  %v129_v17 = vld [vmem:[%s4852_s4 + $0x18] sm:$0xff]  ;;  %v3807_v32 = vshrl.u32 %v297_v31, 7  ;;  %v3809_v33 = vand.u32 127, %v297_v31 }
   0x8   :  { %3378 = vmatpush3.bf16.msra.mxu0 %v3377_v7  ;;  %v3383_v15 = vpack.c.bf16 %v127_v14, %v126_v13  ;;  %v3386_v18 = vpack.c.bf16 %v129_v17, %v128_v16  ;;  %v2518_v19 = vld [vmem:[%s4851_s3] ss:$0 sm:$0xff]  ;;  %v214_v26 = vld [vmem:[%s4854_s6 + $0x8] sm:$0xff]  ;;  %v215_v28 = vld [vmem:[%s4854_s6 + $0x10] sm:$0xff]  ;;  %v3679_v42 = vmov 1.0|1.0  }
   0x9   :  { %3379 = vmatprep.subr.bf16.mxu0 %v3676_v3  ;;  %v213_v25 = vld [vmem:[%s4854_s6] sm:$0xff]  ;;  %v216_v29 = vld [vmem:[%s4854_s6 + $0x18] sm:$0xff]  ;;  %v3812_v34 = vadd.s32 8, %v3807_v32  ;;  %v307_v35 = vmul.u32 3, %v3809_v33  ;;  %v3816_v36 = vadd.s32 16, %v3807_v32  ;;  %v3819_v37 = vadd.s32 24, %v3807_v32 }
   0xa   :  { %3384 = vmatpush3.bf16.msra.mxu1 %v3383_v15  ;;  %v3389_v27 = vpack.c.bf16 %v214_v26, %v213_v25  ;;  %v3392_v30 = vpack.c.bf16 %v216_v29, %v215_v28  ;;  %v3822_v39 = vadd.s32 32, %v3807_v32  ;;  %v3825_v40 = vadd.s32 40, %v3807_v32  ;;  %v3975_v59 = vld [vmem:[%s4849_s1] sm:$0xff] }
   0xb   :  { %3385 = vmatprep.subr.bf16.mxu1 %v3676_v3  ;;  %v308_v38 = vadd.s32 3, %v307_v35  ;;  %v3846_v44 = vadd.s32 48, %v3807_v32  ;;  %v330_v45 = vadd.s32 4, %v307_v35  ;;  %v352_v50 = vadd.s32 5, %v307_v35  ;;  %v2521_v1 = vld [vmem:[%s4853_s5] ss:$0 sm:$0xff] }
   0xc   :  { %3381 = vmatpush3.bf16.msra.mxu0 %v3380_v10  ;;  %v3954_v57 = vmul.u32 6, %v3809_v33  ;;  %v3994_v60 = vadd.s32 56, %v3807_v32  ;;  %v4003_v61 = vadd.s32 64, %v3807_v32  ;;  %v4006_v62 = vadd.s32 72, %v3807_v32 }
   0xd   :  { %3007 = vmatprep.subr.mxu0 %v3678_v6  ;;  %vm309_vm4 = vcmp.eq.s32.totalorder %v3807_v32, %v308_v38  ;;  %vm310_vm5 = vcmp.eq.s32.totalorder %v3812_v34, %v308_v38  ;;  %vm311_vm6 = vcmp.eq.s32.totalorder %v3816_v36, %v308_v38  ;;  %vm312_vm7 = vcmp.eq.s32.totalorder %v3819_v37, %v308_v38 }
   0xe   :  { %3387 = vmatpush3.bf16.msra.mxu1 %v3386_v18  ;;  %vm3831_vm8 = vmpackc.low %vm310_vm5, %vm309_vm4  ;;  %vm313_vm10 = vcmp.eq.s32.totalorder %v3822_v39, %v308_v38  ;;  %vm314_vm11 = vcmp.eq.s32.totalorder %v3825_v40, %v308_v38  ;;  %vm315_vm13 = vcmp.eq.s32.totalorder %v3846_v44, %v308_v38  ;;  %vm331_vm14 = vcmp.eq.s32.totalorder %v3807_v32, %v330_v45 }
   0xf   :  { %3388 = vmatprep.subr.bf16.mxu1 %v3676_v3  ;;  %vm3839_vm9 = vmpackc.low %vm312_vm7, %vm311_vm6  ;;  %vm332_vm15 = vcmp.eq.s32.totalorder %v3812_v34, %v330_v45  ;;  %v3864_v47 = vsel %vm315_vm13, 1.0, %v3678_v6  ;;  %vm333_vm5 = vcmp.eq.s32.totalorder %v3816_v36, %v330_v45  ;;  %vm334_vm6 = vcmp.eq.s32.totalorder %v3819_v37, %v330_v45 }
  0x10   :  { %3008 = vmatpush3.msk.msra.mxu0 %vm4862_vm1, %v38_v11  ;;  %vm3852_vm12 = vmpackc.low %vm314_vm11, %vm313_vm10  ;;  %vm335_vm10 = vcmp.eq.s32.totalorder %v3822_v39, %v330_v45  ;;  %vm336_vm11 = vcmp.eq.s32.totalorder %v3825_v40, %v330_v45  ;;  %v3961_v58 = vadd.s32 3, %v3954_v57  ;;  %v4015_v63 = vadd.s32 80, %v3807_v32 }
  0x11   :  { %3010 = vmatmul.mubr.msk.f32.vlgmr.msra.gmra.mrb[0].mxu0 %vm4860_vm2, %v3765_v12  ;;  %3394 = vmatprep.subr.bf16.mxu0 %v3676_v3  ;;  %vm3866_vm4 = vmpackc.low %vm332_vm15, %vm331_vm14  ;;  %vm337_vm14 = vcmp.eq.s32.totalorder %v3846_v44, %v330_v45  ;;  %vm353_vm15 = vcmp.eq.s32.totalorder %v3807_v32, %v352_v50  ;;  %v4018_v0 = vadd.s32 88, %v3807_v32  ;;  %v853_v9 = vadd.s32 4, %v3954_v57 }
  0x12   :  { %3048 = vmatprep.mubr.msk.f32.mxu0 %vm4858_vm0, %v3678_v6  ;;  %3396 = vmatpush3.bf16.msk.msra.mxu0 %vm3831_vm8, %v3679_v42  ;;  %vm3883_vm7 = vmpackc.low %vm334_vm6, %vm333_vm5  ;;  %vm354_vm5 = vcmp.eq.s32.totalorder %v3812_v34, %v352_v50  ;;  %v2538_v52 = vsel %vm337_vm14, 1.0, %v3678_v6  ;;  %v4100_v10 = vadd.s32 96, %v3807_v32  ;;  %v3681_v54 = vmov 2475754826  }
  0x13   :  { %3397 = vmatprep.subr.bf16.mxu0 %v3676_v3  ;;  %vm3893_vm13 = vmpackc.low %vm336_vm11, %vm335_vm10  ;;  %vm355_vm10 = vcmp.eq.s32.totalorder %v3816_v36, %v352_v50  ;;  %vm356_vm11 = vcmp.eq.s32.totalorder %v3819_v37, %v352_v50 }
  0x14   :  { %vm3905_vm6 = vmpackc.low %vm354_vm5, %vm353_vm15  ;;  %vm357_vm15 = vcmp.eq.s32.totalorder %v3822_v39, %v352_v50  ;;  %vm358_vm5 = vcmp.eq.s32.totalorder %v3825_v40, %v352_v50 }
  0x15   :  { %vm3921_vm14 = vmpackc.low %vm356_vm11, %vm355_vm10  ;;  %vm4881_vm10 = vmmov 0  }
  0x16   :  { %3399 = vmatpush3.bf16.msk.msra.mxu0 %vm3839_vm9, %v3679_v42 }
  0x17   :  { %3400 = vmatprep.subr.bf16.mxu0 %v3676_v3 }
  0x1a   :  { %3402 = vmatpush3.bf16.msk.msra.mxu0 %vm3852_vm12, %v3679_v42 }
  0x1b   :  { %3046 = vmatprep.subr.mxu0 %v3678_v6 }
  0x1e   :  { %3047 = vmatpush3.msk.msra.mxu0 %vm4862_vm1, %v3864_v47 }
  0x1f   :  { %3403 = vmatprep.subr.bf16.mxu0 %v3676_v3  ;;  %3049 = vmatmul.mubr.msk.f32.vlgmr.msra.gmra.mrb[2].mxu0 %vm4860_vm2, %v3765_v12 }
  0x20   :  { %3405 = vmatpush3.bf16.msk.msra.mxu0 %vm3866_vm4, %v3679_v42  ;;  %3065 = vmatprep.mubr.msk.f32.mxu0 %vm4858_vm0, %v3678_v6 }
  0x21   :  { %3406 = vmatprep.subr.bf16.mxu0 %v3676_v3 }
  0x24   :  { %3408 = vmatpush3.bf16.msk.msra.mxu0 %vm3883_vm7, %v3679_v42 }
  0x25   :  { %3409 = vmatprep.subr.bf16.mxu0 %v3676_v3 }
  0x28   :  { %3411 = vmatpush3.bf16.msk.msra.mxu0 %vm3893_vm13, %v3679_v42 }
  0x29   :  { %3063 = vmatprep.subr.mxu0 %v3678_v6 }
  0x2c   :  { %3064 = vmatpush3.msk.msra.mxu0 %vm4862_vm1, %v2538_v52 }
  0x2d   :  { %3412 = vmatprep.subr.bf16.mxu0 %v3676_v3  ;;  %3066 = vmatmul.mubr.msk.f32.vlgmr.msra.gmra.mrb[4].mxu0 %vm4860_vm2, %v3765_v12 }
  0x2e   :  { %3414 = vmatpush3.bf16.msk.msra.mxu0 %vm3905_vm6, %v3679_v42  ;;  %3082 = vmatprep.mubr.msk.f32.mxu0 %vm4858_vm0, %v3678_v6 }
  0x2f   :  { %3415 = vmatprep.subr.bf16.mxu0 %v3676_v3 }
  0x32   :  { %3417 = vmatpush3.bf16.msk.msra.mxu0 %vm3921_vm14, %v3679_v42 }
  0x33   :  { %3418 = vmatprep.subr.bf16.mxu0 %v3676_v3 }
  0xe4   :  { %v120_v20 = vpop.f32.mrb[0].mxu0 }
  0xe5   :  { %v121_v21 = vadd.f32 %v2518_v19, %v120_v20  ;;  %v3011_v22 = vpop.f32.mrb[1].mxu0 }
  0xe7   :  { %v124_v23 = vmul.f32 0.01, %v121_v21 }
  0xe9   :  { %v125_v24 = vmax.f32 %v121_v21, %v124_v23 }
  0xeb   :  { %3021 = vmatmul.mubr.msk.f32.vlgmr.msra.gmra.mrb[0].mxu1 %vm4857_vm3, %v125_v24  ;;  %vm3931_vm3 = vmpackc.low %vm358_vm5, %vm357_vm15  ;;  %vm818_vm5 = vcmp.eq.s32.totalorder %v3822_v39, %v3961_v58 }
  0xec   :  { %3031 = vmatprep.mubr.msk.f32.mxu1 %vm4858_vm0, %v3678_v6  ;;  %3390 = vmatpush3.bf16.msra.mxu1 %v3389_v27  ;;  %vm359_vm0 = vcmp.eq.s32.totalorder %v3846_v44, %v352_v50 }
  0xed   :  { %3391 = vmatprep.subr.bf16.mxu1 %v3676_v3  ;;  %3420 = vmatpush3.bf16.msk.msra.mxu0 %vm3931_vm3, %v3679_v42  ;;  %v3941_v56 = vsel %vm359_vm0, 1.0, %v3678_v6  ;;  %vm814_vm0 = vcmp.eq.s32.totalorder %v3807_v32, %v3961_v58 }
  0xee   :  { %3080 = vmatprep.subr.mxu0 %v3678_v6 }
  0xf0   :  { %3393 = vmatpush3.bf16.msra.mxu1 %v3392_v30 }
  0xf1   :  { %3421 = vmatprep.subr.bf16.mxu1 %v3676_v3  ;;  %3081 = vmatpush3.msk.msra.mxu0 %vm4862_vm1, %v3941_v56 }
  0xf2   :  { %3083 = vmatmul.mubr.msk.f32.vlgmr.msra.gmra.mrb[6].mxu0 %vm4860_vm2, %v3765_v12  ;;  %3430 = vmatprep.subr.bf16.mxu0 %v3676_v3  ;;  %v443_v13 = vpop.f32.mrb[2].mxu0 }
  0xf3   :  { %3432 = vmatpush3.bf16.msk.msra.mxu0 %vm3866_vm4, %v3679_v42  ;;  %3116 = vmatprep.mubr.msk.f32.mxu0 %vm4881_vm10, %v3678_v6  ;;  %vm815_vm4 = vcmp.eq.s32.totalorder %v3812_v34, %v3961_v58  ;;  %v3050_v14 = vpop.f32.mrb[3].mxu0  ;;  %v1680_v15 = vmul.f32 %v443_v13, %v443_v13 }
  0xf4   :  { %3433 = vmatprep.subr.bf16.mxu0 %v3676_v3  ;;  %vm3449_vm11 = vmpackc.low %vm815_vm4, %vm814_vm0  ;;  %vm819_vm0 = vcmp.eq.s32.totalorder %v3825_v40, %v3961_v58 }
  0xf5   :  { %vm3455_vm4 = vmpackc.low %vm819_vm0, %vm818_vm5  ;;  %vm823_vm5 = vcmp.eq.s32.totalorder %v4006_v62, %v3961_v58 }
  0xf7   :  { %3435 = vmatpush3.bf16.msk.msra.mxu0 %vm3883_vm7, %v3679_v42  ;;  %vm816_vm7 = vcmp.eq.s32.totalorder %v3816_v36, %v3961_v58 }
  0xf8   :  { %3436 = vmatprep.subr.bf16.mxu0 %v3676_v3 }
  0xfb   :  { %3438 = vmatpush3.bf16.msk.msra.mxu0 %vm3893_vm13, %v3679_v42  ;;  %vm817_vm13 = vcmp.eq.s32.totalorder %v3819_v37, %v3961_v58 }
  0xfc   :  { %3114 = vmatprep.subr.mxu0 %v3678_v6  ;;  %vm3452_vm15 = vmpackc.low %vm817_vm13, %vm816_vm7  ;;  %vm821_vm7 = vcmp.eq.s32.totalorder %v3994_v60, %v3961_v58 }
  0xff   :  { %3115 = vmatpush3.msk.msra.mxu0 %vm4862_vm1, %v2538_v52  ;;  %v3680_v52 = vmov 683565275  }
 0x100   :  { %3117 = vmatmul.mubr.msk.f32.vlgmr.msra.gmra.mrb[8].mxu0 %vm4860_vm2, %v3975_v59  ;;  %3448 = vmatprep.subr.bf16.mxu0 %v3676_v3  ;;  %v516_v16 = vpop.f32.mrb[4].mxu0 }
 0x101   :  { %3450 = vmatpush3.bf16.msk.msra.mxu0 %vm3449_vm11, %v3679_v42  ;;  %3162 = vmatprep.mubr.msk.f32.mxu0 %vm4881_vm10, %v3678_v6  ;;  %vm820_vm11 = vcmp.eq.s32.totalorder %v3846_v44, %v3961_v58  ;;  %v1681_v17 = vmul.f32 %v516_v16, %v516_v16  ;;  %v3067_v18 = vpop.f32.mrb[5].mxu0 }
 0x102   :  { %3451 = vmatprep.subr.bf16.mxu0 %v3676_v3  ;;  %vm3458_vm13 = vmpackc.low %vm821_vm7, %vm820_vm11  ;;  %vm825_vm11 = vcmp.eq.s32.totalorder %v4018_v0, %v3961_v58 }
 0x103   :  { %v1682_v20 = vadd.f32 %v1681_v17, %v1680_v15 }
 0x105   :  { %3453 = vmatpush3.bf16.msk.msra.mxu0 %vm3452_vm15, %v3679_v42  ;;  %vm822_vm15 = vcmp.eq.s32.totalorder %v4003_v61, %v3961_v58 }
 0x106   :  { %3454 = vmatprep.subr.bf16.mxu0 %v3676_v3  ;;  %vm3461_vm0 = vmpackc.low %vm823_vm5, %vm822_vm15  ;;  %vm858_vm15 = vcmp.eq.s32.totalorder %v3822_v39, %v853_v9  ;;  %vm859_vm5 = vcmp.eq.s32.totalorder %v3825_v40, %v853_v9 }
 0x109   :  { %3456 = vmatpush3.bf16.msk.msra.mxu0 %vm3455_vm4, %v3679_v42  ;;  %vm824_vm4 = vcmp.eq.s32.totalorder %v4015_v63, %v3961_v58 }
 0x10a   :  { %3457 = vmatprep.subr.bf16.mxu0 %v3676_v3  ;;  %vm3464_vm7 = vmpackc.low %vm825_vm11, %vm824_vm4  ;;  %vm860_vm4 = vcmp.eq.s32.totalorder %v3846_v44, %v853_v9  ;;  %vm861_vm11 = vcmp.eq.s32.totalorder %v3994_v60, %v853_v9 }
 0x10d   :  { %3459 = vmatpush3.bf16.msk.msra.mxu0 %vm3458_vm13, %v3679_v42  ;;  %vm4882_vm13 = vcmask 261120  }
 0x10e   :  { %3460 = vmatprep.subr.bf16.mxu0 %v3676_v3 }
 0x111   :  { %3462 = vmatpush3.bf16.msk.msra.mxu0 %vm3461_vm0, %v3679_v42  ;;  %vm3473_vm0 = vmpackc.low %vm859_vm5, %vm858_vm15  ;;  %vm866_vm15 = vcmp.eq.s32.totalorder %v4100_v10, %v853_v9 }
 0x112   :  { %3463 = vmatprep.subr.bf16.mxu0 %v3676_v3  ;;  %v2619_v12 = vsel %vm866_vm15, 1.0, %v3678_v6 }
 0x115   :  { %3465 = vmatpush3.bf16.msk.msra.mxu0 %vm3464_vm7, %v3679_v42  ;;  %vm3476_vm7 = vmpackc.low %vm861_vm11, %vm860_vm4 }
 0x116   :  { %3160 = vmatprep.subr.mxu0 %v3678_v6 }
 0x1be   :  { %v207_v2 = vpop.f32.mrb[0].mxu1 }
 0x1bf   :  { %v208_v4 = vadd.f32 %v2521_v1, %v207_v2  ;;  %v3022_v5 = vpop.f32.mrb[1].mxu1  ;;  %v3684_v2 = vmov 920167782  }
 0x1c1   :  { %v211_v7 = vmul.f32 0.01, %v208_v4 }
 0x1c3   :  { %v212_v8 = vmax.f32 %v208_v4, %v211_v7 }
 0x1c5   :  { %3032 = vmatmul.mubr.msk.f32.vlgmr.msra.gmra.mrb[2].mxu1 %vm4882_vm13, %v212_v8  ;;  %vm862_vm13 = vcmp.eq.s32.totalorder %v4003_v61, %v853_v9  ;;  %v589_v19 = vpop.f32.mrb[6].mxu0 }
 0x1c6   :  { %3423 = vmatpush3.bf16.msk.msra.mxu1 %vm3831_vm8, %v3679_v42  ;;  %3099 = vmatprep.mubr.msk.f32.mxu1 %vm4881_vm10, %v3678_v6  ;;  %vm854_vm8 = vcmp.eq.s32.totalorder %v3807_v32, %v853_v9  ;;  %v1683_v21 = vmul.f32 %v589_v19, %v589_v19  ;;  %v3084_v22 = vpop.f32.mrb[7].mxu0 }
 0x1c7   :  { %3424 = vmatprep.subr.bf16.mxu1 %v3676_v3 }
 0x1c8   :  { %v1684_v23 = vadd.f32 %v1683_v21, %v1682_v20 }
 0x1ca   :  { %3426 = vmatpush3.bf16.msk.msra.mxu1 %vm3839_vm9, %v3679_v42  ;;  %vm855_vm9 = vcmp.eq.s32.totalorder %v3812_v34, %v853_v9  ;;  %v1685_v24 = vmax.f32 %v1684_v23, 1e-16 }
 0x1cb   :  { %3427 = vmatprep.subr.bf16.mxu1 %v3676_v3 }
 0x1cc   :  { %3613 = vrsqrt.f32 %v1685_v24 }
 0x1ce   :  { %3429 = vmatpush3.bf16.msk.msra.mxu1 %vm3852_vm12, %v3679_v42  ;;  %vm3467_vm12 = vmpackc.low %vm855_vm9, %vm854_vm8  ;;  %vm863_vm8 = vcmp.eq.s32.totalorder %v4006_v62, %v853_v9 }
 0x1cf   :  { %3097 = vmatprep.subr.mxu1 %v3678_v6  ;;  %vm3479_vm9 = vmpackc.low %vm863_vm8, %vm862_vm13 }
 0x1d2   :  { %3098 = vmatpush3.msk.msra.mxu1 %vm4862_vm1, %v3864_v47 }
 0x1d3   :  { %3439 = vmatprep.subr.bf16.mxu1 %v3676_v3  ;;  %3100 = vmatmul.mubr.msk.f32.vlgmr.msra.gmra.mrb[4].mxu1 %vm4860_vm2, %v3975_v59  ;;  %v4121_v43 = vpop.f32.mrb[8].mxu0 }
 0x1d4   :  { %3441 = vmatpush3.bf16.msk.msra.mxu1 %vm3905_vm6, %v3679_v42  ;;  %3133 = vmatprep.mubr.msk.f32.mxu1 %vm4881_vm10, %v3678_v6  ;;  %vm856_vm6 = vcmp.eq.s32.totalorder %v3816_v36, %v853_v9  ;;  %v3118_v46 = vpop.f32.mrb[9].mxu0 }
 0x1d5   :  { %3442 = vmatprep.subr.bf16.mxu1 %v3676_v3 }
 0x1d6   :  { %v3614_v25 = vpop.eup %3613 }
 0x1d7   :  { %v4111_v26 = vmul.f32 %v3614_v25, %v1685_v24  ;;  %v4113_v27 = vmul.f32 %v3614_v25, %v443_v13  ;;  %v4115_v28 = vmul.f32 %v3614_v25, %v516_v16  ;;  %v4117_v29 = vmul.f32 %v3614_v25, %v589_v19 }
 0x1d8   :  { %3444 = vmatpush3.bf16.msk.msra.mxu1 %vm3921_vm14, %v3679_v42  ;;  %vm857_vm14 = vcmp.eq.s32.totalorder %v3819_v37, %v853_v9 }
 0x1d9   :  { %3445 = vmatprep.subr.bf16.mxu1 %v3676_v3  ;;  %v1694_v30 = vand.u32 2139095040, %v4111_v26  ;;  %v1691_v35 = vand.u32 2147483647, %v4111_v26 }
 0x1db   :  { %v1695_v31 = vshrl.u32 %v1694_v30, 23  ;;  %v1698_v45 = vand.u32 8388607, %v1691_v35 }
 0x1dc   :  { %3447 = vmatpush3.bf16.msk.msra.mxu1 %vm3931_vm3, %v3679_v42  ;;  %vm3470_vm3 = vmpackc.low %vm857_vm14, %vm856_vm6  ;;  %vm865_vm6 = vcmp.eq.s32.totalorder %v4018_v0, %v853_v9 }
 0x1dd   :  { %3131 = vmatprep.subr.mxu1 %v3678_v6  ;;  %v2791_v38 = vadd.s32 4294967169, %v1695_v31  ;;  %v1699_v49 = vor.u32 8388608, %v1698_v45 }
 0x1df   :  { %v1701_v41 = vadd.s32 1, %v2791_v38  ;;  %v1739_v14 = vshll.u32 %v1699_v49, 8 }
 0x1e0   :  { %3132 = vmatpush3.msk.msra.mxu1 %vm4862_vm1, %v3941_v56  ;;  %v3682_v56 = vmov 2131351028  }
 0x1e1   :  { %3134 = vmatmul.mubr.msk.f32.vlgmr.msra.gmra.mrb[6].mxu1 %vm4860_vm2, %v3975_v59  ;;  %3466 = vmatprep.subr.bf16.mxu1 %v3676_v3  ;;  %vm1702_vm5 = vcmp.gt.s32.totalorder %v1701_v41, 0  ;;  %v3683_v59 = vmov 2102212464  }
 0x1e2   :  { %3468 = vmatpush3.bf16.msk.msra.mxu1 %vm3467_vm12, %v3679_v42  ;;  %3191 = vmatprep.mubr.msk.f32.mxu1 %vm4881_vm10, %v3678_v6  ;;  %vm864_vm12 = vcmp.eq.s32.totalorder %v4015_v63, %v853_v9  ;;  %v1703_v47 = vsel %vm1702_vm5, %v1701_v41, 0 }
 0x1e3   :  { %3469 = vmatprep.subr.bf16.mxu1 %v3676_v3  ;;  %vm3482_vm14 = vmpackc.low %vm865_vm6, %vm864_vm12  ;;  %v1705_v48 = vand.u32 31, %v1703_v47  ;;  %v1704_v50 = vshrl.u32 %v1703_v47, 5 }
 0x1e5   :  { %v1706_v51 = vsub.s32 32, %v1705_v48  ;;  %v1708_v53 = vshll.u32 %v3680_v52, %v1705_v48  ;;  %v1711_v55 = vshll.u32 %v3681_v54, %v1705_v48  ;;  %v1717_v1 = vshll.u32 %v3683_v59, %v1705_v48 }
 0x1e6   :  { %3471 = vmatpush3.bf16.msk.msra.mxu1 %vm3470_vm3, %v3679_v42  ;;  %vm826_vm3 = vcmp.eq.s32.totalorder %v4100_v10, %v3961_v58  ;;  %v1714_v58 = vshll.u32 %v3682_v56, %v1705_v48  ;;  %v1720_v4 = vshll.u32 %v3684_v2, %v1705_v48  ;;  %vm1726_vm4 = vcmp.lt.s32.totalorder %v1704_v50, 4 }
 0x1e7   :  { %3472 = vmatprep.subr.bf16.mxu1 %v3676_v3  ;;  %v2606_v11 = vsel %vm826_vm3, 1.0, %v3678_v6  ;;  %v1707_v5 = vshrl.u32 %v3680_v52, %v1706_v51  ;;  %v1709_v7 = vshrl.u32 %v3681_v54, %v1706_v51  ;;  %v1712_v8 = vshrl.u32 %v3682_v56, %v1706_v51 }
 0x1e8   :  { %3161 = vmatpush3.msk.msra.mxu0 %vm4862_vm1, %v2606_v11  ;;  %v1715_v9 = vshrl.u32 %v3683_v59, %v1706_v51  ;;  %v1718_v11 = vshrl.u32 %v3684_v2, %v1706_v51  ;;  %vm1724_vm11 = vcmp.lt.s32.totalorder %v1704_v50, 2  ;;  %vm4861_vm3 = vcmask 809984  }
 0x1e9   :  { %3484 = vmatprep.subr.bf16.mxu0 %v3676_v3  ;;  %v1710_v15 = vor.u32 %v1709_v7, %v1708_v53  ;;  %v1713_v16 = vor.u32 %v1712_v8, %v1711_v55 }
 0x1ea   :  { %3474 = vmatpush3.bf16.msk.msra.mxu1 %vm3473_vm0, %v3679_v42  ;;  %vm1723_vm0 = vcmp.lt.s32.totalorder %v1704_v50, 1  ;;  %v1716_v17 = vor.u32 %v1715_v9, %v1714_v58  ;;  %v1719_v18 = vor.u32 %v1718_v11, %v1717_v1 }
 0x1eb   :  { %3475 = vmatprep.subr.bf16.mxu1 %v3676_v3  ;;  %v1727_v20 = vsel %vm1723_vm0, %v1707_v5, %v1710_v15  ;;  %v1731_v22 = vsel %vm1723_vm0, %v1710_v15, %v1713_v16 }
 0x1ec   :  { %v1728_v21 = vsel %vm1726_vm4, %v1716_v17, 2102212464  ;;  %v1735_v23 = vsel %vm1723_vm0, %v1713_v16, %v1716_v17  ;;  %v1732_v25 = vsel %vm1726_vm4, %v1719_v18, 920167782 }
 0x1ee   :  { %3477 = vmatpush3.bf16.msk.msra.mxu1 %vm3476_vm7, %v3679_v42  ;;  %vm1725_vm7 = vcmp.lt.s32.totalorder %v1704_v50, 3 }
 0x1ef   :  { %3478 = vmatprep.subr.bf16.mxu1 %v3676_v3  ;;  %v1729_v24 = vsel %vm1725_vm7, %v1713_v16, %v1728_v21  ;;  %v1733_v31 = vsel %vm1725_vm7, %v1716_v17, %v1732_v25  ;;  %v4147_v21 = vadd.s32 5, %v3954_v57 }
 0x1f0   :  { %v1730_v41 = vsel %vm1724_vm11, %v1727_v20, %v1729_v24  ;;  %v1734_v45 = vsel %vm1724_vm11, %v1731_v22, %v1733_v31  ;;  %v4150_v22 = vadd.s32 6, %v3954_v57  ;;  %v2523_v31 = vld [vmem:[%s4855_s7] ss:$0 sm:$0xff] }
 0x1f1   :  { %v1746_v53 = vmul.u32 %v1739_v14, %v1730_v41  ;;  %vm895_vm12 = vcmp.eq.s32.totalorder %v3812_v34, %v4147_v21  ;;  %vm896_vm5 = vcmp.eq.s32.totalorder %v3816_v36, %v4147_v21 }
 0x1f2   :  { %3480 = vmatpush3.bf16.msk.msra.mxu1 %vm3479_vm9, %v3679_v42  ;;  %vm894_vm9 = vcmp.eq.s32.totalorder %v3807_v32, %v4147_v21  ;;  %vm934_vm6 = vcmp.eq.s32.totalorder %v3807_v32, %v4150_v22 }
 0x1f3   :  { %3481 = vmatprep.subr.bf16.mxu1 %v3676_v3  ;;  %vm3485_vm15 = vmpackc.low %vm895_vm12, %vm894_vm9 }
 0x1f6   :  { %3483 = vmatpush3.bf16.msk.msra.mxu1 %vm3482_vm14, %v3679_v42  ;;  %vm935_vm14 = vcmp.eq.s32.totalorder %v3812_v34, %v4150_v22 }
 0x1f7   :  { %3189 = vmatprep.subr.mxu1 %v3678_v6  ;;  %vm3503_vm0 = vmpackc.low %vm935_vm14, %vm934_vm6  ;;  %vm898_vm6 = vcmp.eq.s32.totalorder %v3822_v39, %v4147_v21  ;;  %vm899_vm14 = vcmp.eq.s32.totalorder %v3825_v40, %v4147_v21 }
 0x1fa   :  { %3190 = vmatpush3.msk.msra.mxu1 %vm4862_vm1, %v2619_v12  ;;  %v3685_v12 = vmov 1326507024  }
 0x1fb   :  { %3502 = vmatprep.subr.bf16.mxu1 %v3676_v3  ;;  %v1721_v13 = vshrl.u32 %v3685_v12, %v1706_v51  ;;  %v4139_v49 = vmul.u32.u64.low %v1739_v14, %v1734_v45  ;;  %v4140_v51 = vmul.u32.u64.high %v1739_v14, %v1734_v45, %v4139_v49 }
 0x1fd   :  { %v1722_v19 = vor.u32 %v1721_v13, %v1720_v4  ;;  %v1749_v50 = vadd.s32 1, %v4140_v51 }
 0x1ff   :  { %v1736_v30 = vsel %vm1726_vm4, %v1722_v19, 1326507024  ;;  %vm897_vm4 = vcmp.eq.s32.totalorder %v3819_v37, %v4147_v21 }
 0x200   :  { %v1737_v38 = vsel %vm1725_vm7, %v1719_v18, %v1736_v30  ;;  %vm1693_vm7 = vcmp.lt.s32.totalorder %v4111_v26, 0  ;;  %vm3488_vm9 = vmpackc.low %vm897_vm4, %vm896_vm5  ;;  %vm939_vm5 = vcmp.eq.s32.totalorder %v3825_v40, %v4150_v22 }
 0x201   :  { %v1738_v46 = vsel %vm1724_vm11, %v1735_v23, %v1737_v38  ;;  %vm936_vm11 = vcmp.eq.s32.totalorder %v3816_v36, %v4150_v22 }
 0x202   :  { %v4136_v47 = vmul.u32.u64.low %v1739_v14, %v1738_v46  ;;  %v4137_v48 = vmul.u32.u64.high %v1739_v14, %v1738_v46, %v4136_v47 }
 0x204   :  { %vm1748_vm13 = vc.u32 %v4137_v48, %v4139_v49  ;;  %v1747_v15 = vadd.s32 %v4139_v49, %v4137_v48 }
 0x205   :  { %v1750_v55 = vsel %vm1748_vm13, %v1749_v50, %v4140_v51  ;;  %vm937_vm13 = vcmp.eq.s32.totalorder %v3819_v37, %v4150_v22 }
 0x206   :  { %v1751_v58 = vadd.s32 %v1750_v55, %v1746_v53  ;;  %vm3506_vm12 = vmpackc.low %vm937_vm13, %vm936_vm11  ;;  %vm900_vm11 = vcmp.eq.s32.totalorder %v3846_v44, %v4147_v21  ;;  %vm940_vm13 = vcmp.eq.s32.totalorder %v3846_v44, %v4150_v22 }
 0x208   :  { %v1752_v1 = vadd.s32 536870912, %v1751_v58 }
 0x20a   :  { %v1753_v4 = vshrl.u32 %v1752_v1, 30 }
 0x20c   :  { %v1754_v5 = vshll.u32 %v1753_v4, 30  ;;  %v1777_v41 = vsub.s32 4, %v1753_v4 }
 0x20e   :  { %v1755_v7 = vsub.s32 %v1751_v58, %v1754_v5  ;;  %v1778_v51 = vsel %vm1693_vm7, %v1777_v41, %v1753_v4 }
 0x210   :  { %v1757_v8 = vsub.s32 0, %v1755_v7 }
 0x212   :  { %v2792_v9 = vmin.u32 %v1757_v8, %v1755_v7  ;;  %v4239_v8 = vadd.s32 7, %v3954_v57 }
 0x214   :  { %v1759_v11 = vclz %v2792_v9  ;;  %vm974_vm1 = vcmp.eq.s32.totalorder %v3807_v32, %v4239_v8 }
 0x216   :  { %v2793_v13 = vadd.s32 4294967294, %v1759_v11 }
 0x218   :  { %vm2794_vm8 = vcmp.lt.s32.totalorder %v2793_v13, 0 }
 0x219   :  { %v1762_v16 = vsel %vm2794_vm8, 0, %v2793_v13  ;;  %vm1692_vm8 = vcmp.le.f32.partialorder %v1691_v35, 0.7853982 }
 0x21a   :  { %v1763_v14 = vsub.s32 32, %v1762_v16  ;;  %v1764_v17 = vshll.u32 %v1755_v7, %v1762_v16  ;;  %v1767_v18 = vsub.s32 4294967266, %v1762_v16  ;;  %v1780_v50 = vsel %vm1692_vm8, 0, %v1778_v51 }
 0x21b   :  { %v1784_v55 = vadd.s32 3, %v1780_v50  ;;  %v1888_v4 = vand.u32 3, %v1780_v50  ;;  %v1931_v7 = vmul.f32 %v4121_v43, %v4121_v43 }
 0x21c   :  { %v1765_v19 = vshrl.u32 %v1747_v15, %v1763_v14  ;;  %v1768_v20 = vadd.s32 127, %v1767_v18  ;;  %v4270_v14 = vadd.s32 8, %v3954_v57 }
 0x21d   :  { %v1785_v1 = vand.u32 3, %v1784_v55 }
 0x21e   :  { %v1766_v23 = vor.u32 %v1765_v19, %v1764_v17  ;;  %v1769_v24 = vshll.u32 %v1768_v20, 23 }
 0x21f   :  { %vm1786_vm2 = vcmp.lt.s32.totalorder %v1785_v1, 2 }
 0x220   :  { %v1770_v25 = vor.u32 4788187, %v1769_v24  ;;  %v1773_v30 = vcvt.s32.f32 %v1766_v23 }
 0x222   :  { %v1771_v38 = vand.u32 2147483647, %v1770_v25 }
 0x224   :  { %v1774_v46 = vmul.f32 %v1773_v30, %v1771_v38 }
 0x226   :  { %v1775_v49 = vxor.u32 2147483648, %v1774_v46 }
 0x228   :  { %v1776_v53 = vsel %vm1693_vm7, %v1775_v49, %v1774_v46  ;;  %vm901_vm7 = vcmp.eq.s32.totalorder %v3994_v60, %v4147_v21 }
 0x229   :  { %v1779_v35 = vsel %vm1692_vm8, %v4111_v26, %v1776_v53  ;;  %vm941_vm8 = vcmp.eq.s32.totalorder %v3994_v60, %v4150_v22 }
 0x22a   :  { %3615 = vcosq.f32 %v1779_v35 }
 0x22b   :  { %3617 = vsinq.f32 %v1779_v35 }
 0x234   :  { %v3616_v15 = vpop.eup %3615 }
 0x235   :  { %v3618_v17 = vpop.eup %3617  ;;  %v1791_v18 = vxor.u32 2147483648, %v3616_v15 }
 0x236   :  { %v1788_v57 = vxor.u32 2147483648, %v3618_v17 }
 0x298   :  { %v293_v45 = vpop.f32.mrb[2].mxu1 }
 0x299   :  { %v4165_v47 = vadd.f32 %v2523_v31, %v293_v45  ;;  %v3033_v48 = vpop.f32.mrb[3].mxu1 }
 0x29b   :  { %3163 = vmatmul.mubr.msk.f32.vlgmr.msra.gmra.mrb[10].mxu0 %vm4861_vm3, %v4165_v47  ;;  %3192 = vmatmul.mubr.msk.f32.vlgmr.msra.gmra.mrb[8].mxu1 %vm4861_vm3, %v4165_v47  ;;  %vm1893_vm3 = vcmp.eq.s32.totalorder %v1888_v4, 2 }
 0x29c   :  { %3486 = vmatpush3.bf16.msk.msra.mxu0 %vm3485_vm15, %v3679_v42  ;;  %3504 = vmatpush3.bf16.msk.msra.mxu1 %vm3503_vm0, %v3679_v42  ;;  %vm938_vm15 = vcmp.eq.s32.totalorder %v3822_v39, %v4150_v22  ;;  %vm3491_vm0 = vmpackc.low %vm899_vm14, %vm898_vm6  ;;  %vm903_vm14 = vcmp.eq.s32.totalorder %v4006_v62, %v4147_v21  ;;  %v1895_v23 = vsel %vm1893_vm3, %v1791_v18, %v3618_v17 }
 0x29d   :  { %3487 = vmatprep.subr.bf16.mxu0 %v3676_v3  ;;  %3505 = vmatprep.subr.bf16.mxu1 %v3676_v3  ;;  %vm3509_vm4 = vmpackc.low %vm939_vm5, %vm938_vm15  ;;  %vm942_vm15 = vcmp.eq.s32.totalorder %v4003_v61, %v4150_v22  ;;  %vm943_vm5 = vcmp.eq.s32.totalorder %v4006_v62, %v4150_v22  ;;  %vm4891_vm3 = vcmp.eq.s32.totalorder %v4015_v63, %v4150_v22 }
 0x29e   :  { %3220 = vmatprep.mubr.msk.f32.mxu0 %vm4881_vm10, %v3678_v6  ;;  %3249 = vmatprep.mubr.msk.f32.mxu1 %vm4881_vm10, %v3678_v6  ;;  %vm4222_vm6 = vmpackc.low %vm941_vm8, %vm940_vm13  ;;  %vm1889_vm13 = vcmp.lt.s32.totalorder %v1888_v4, 2 }
 0x2a0   :  { %3489 = vmatpush3.bf16.msk.msra.mxu0 %vm3488_vm9, %v3679_v42  ;;  %3507 = vmatpush3.bf16.msk.msra.mxu1 %vm3506_vm12, %v3679_v42  ;;  %vm4214_vm9 = vmpackc.low %vm901_vm7, %vm900_vm11  ;;  %vm902_vm12 = vcmp.eq.s32.totalorder %v4003_v61, %v4147_v21  ;;  %vm975_vm7 = vcmp.eq.s32.totalorder %v3812_v34, %v4239_v8  ;;  %vm1783_vm11 = vweird.f32 %v4111_v26 }
 0x2a1   :  { %3490 = vmatprep.subr.bf16.mxu0 %v3676_v3  ;;  %3508 = vmatprep.subr.bf16.mxu1 %v3676_v3  ;;  %vm4263_vm8 = vmpackc.low %vm903_vm14, %vm902_vm12  ;;  %vm1890_vm14 = vcmp.eq.s32.totalorder %v1888_v4, 0 }
 0x2a2   :  { %vm3515_vm12 = vmpackc.low %vm943_vm5, %vm942_vm15  ;;  %vm1014_vm5 = vcmp.eq.s32.totalorder %v3807_v32, %v4270_v14  ;;  %v1892_v30 = vsel %vm1890_vm14, %v3616_v15, %v1788_v57  ;;  %vm979_vm14 = vcmp.eq.s32.totalorder %v3825_v40, %v4239_v8 }
 0x2a3   :  { %v1896_v38 = vsel %vm1889_vm13, %v1892_v30, %v1895_v23  ;;  %vm978_vm13 = vcmp.eq.s32.totalorder %v3822_v39, %v4239_v8 }
 0x2a4   :  { %3492 = vmatpush3.bf16.msk.msra.mxu0 %vm3491_vm0, %v3679_v42  ;;  %3510 = vmatpush3.bf16.msk.msra.mxu1 %vm3509_vm4, %v3679_v42  ;;  %vm904_vm0 = vcmp.eq.s32.totalorder %v4015_v63, %v4147_v21  ;;  %vm905_vm4 = vcmp.eq.s32.totalorder %v4018_v0, %v4147_v21  ;;  %v1897_v45 = vsel %vm1783_vm11, nan, %v1896_v38 }
 0x2a5   :  { %3493 = vmatprep.subr.bf16.mxu0 %v3676_v3  ;;  %3511 = vmatprep.subr.bf16.mxu1 %v3676_v3  ;;  %vm4299_vm15 = vmpackc.low %vm905_vm4, %vm904_vm0  ;;  %vm1015_vm4 = vcmp.eq.s32.totalorder %v3812_v34, %v4270_v14 }
 0x2a6   :  { %v4241_v9 = vpop.f32.mrb[4].mxu1 }
 0x2a7   :  { %v1930_v11 = vmul.f32 %v4241_v9, %v4241_v9  ;;  %v3101_v13 = vpop.f32.mrb[5].mxu1 }
 0x2a8   :  { %3495 = vmatpush3.bf16.msk.msra.mxu0 %vm4214_vm9, %v3679_v42  ;;  %3513 = vmatpush3.bf16.msk.msra.mxu1 %vm4222_vm6, %v3679_v42  ;;  %vm1790_vm9 = vcmp.eq.s32.totalorder %v1785_v1, 2  ;;  %vm1787_vm6 = vcmp.eq.s32.totalorder %v1785_v1, 0 }
 0x2a9   :  { %3496 = vmatprep.subr.bf16.mxu0 %v3676_v3  ;;  %3514 = vmatprep.subr.bf16.mxu1 %v3676_v3  ;;  %v4280_v19 = vadd.f32 %v1931_v7, %v1930_v11  ;;  %v1792_v20 = vsel %vm1790_vm9, %v1791_v18, %v3618_v17  ;;  %v1789_v25 = vsel %vm1787_vm6, %v3616_v15, %v1788_v57 }
 0x2aa   :  { %v1793_v31 = vsel %vm1786_vm2, %v1789_v25, %v1792_v20  ;;  %vm976_vm9 = vcmp.eq.s32.totalorder %v3816_v36, %v4239_v8  ;;  %vm1016_vm6 = vcmp.eq.s32.totalorder %v3816_v36, %v4270_v14  ;;  %vm4893_vm2 = vcmp.eq.s32.totalorder %v4100_v10, %v4147_v21 }
 0x2ab   :  { %v1794_v41 = vsel %vm1783_vm11, nan, %v1793_v31  ;;  %v2632_v26 = vsel %vm4893_vm2, 1.0, %v3678_v6  ;;  %vm1017_vm11 = vcmp.eq.s32.totalorder %v3819_v37, %v4270_v14  ;;  %vm4369_vm2 = vmpackc.low %vm1015_vm4, %vm1014_vm5  ;;  %vm1018_vm5 = vcmp.eq.s32.totalorder %v3822_v39, %v4270_v14 }
 0x2ac   :  { %3498 = vmatpush3.bf16.msk.msra.mxu0 %vm4263_vm8, %v3679_v42  ;;  %3516 = vmatpush3.bf16.msk.msra.mxu1 %vm3515_vm12, %v3679_v42  ;;  %vm4892_vm8 = vcmp.eq.s32.totalorder %v4018_v0, %v4150_v22  ;;  %vm977_vm12 = vcmp.eq.s32.totalorder %v3819_v37, %v4239_v8  ;;  %v1898_v46 = vmul.f32 %v1794_v41, %v4113_v27 }
 0x2ad   :  { %3499 = vmatprep.subr.bf16.mxu0 %v3676_v3  ;;  %3517 = vmatprep.subr.bf16.mxu1 %v3676_v3  ;;  %vm3518_vm0 = vmpackc.low %vm4892_vm8, %vm4891_vm3  ;;  %v1899_v48 = vmul.f32 %v1794_v41, %v4115_v28  ;;  %v1900_v49 = vmul.f32 %v1794_v41, %v4117_v29  ;;  %vm4897_vm8 = vcmask 1042432   ;;  %vm1019_vm4 = vcmp.eq.s32.totalorder %v3825_v40, %v4270_v14 }
 0x2ae   :  { %v1901_v28 = vmul.f32 %v1898_v46, %v1898_v46  ;;  %v1907_v50 = vmul.f32 %v1898_v46, %v1897_v45  ;;  %vm4357_vm3 = vmpackc.low %vm975_vm7, %vm974_vm1  ;;  %vm4901_vm1 = vcmask 809984  }
 0x2af   :  { %v1902_v29 = vmul.f32 %v1899_v48, %v1899_v48  ;;  %v1903_v21 = vmul.f32 %v1900_v49, %v1900_v49  ;;  %v1904_v51 = vmul.f32 %v1899_v48, %v1898_v46  ;;  %v1905_v53 = vmul.f32 %v1900_v49, %v1898_v46  ;;  %vm4902_vm7 = vmmov %vm4901_vm1 }
 0x2b0   :  { %3501 = vmatpush3.bf16.msk.msra.mxu0 %vm4299_vm15, %v3679_v42  ;;  %3519 = vmatpush3.bf16.msk.msra.mxu1 %vm3518_vm0, %v3679_v42  ;;  %vm4894_vm15 = vcmp.eq.s32.totalorder %v4100_v10, %v4150_v22  ;;  %v1906_v35 = vmul.f32 %v1900_v49, %v1899_v48  ;;  %v1908_v58 = vmul.f32 %v1899_v48, %v1897_v45  ;;  %vm4898_vm0 = vmmov %vm4897_vm8  ;;  %v1921_v13 = vmul.f32 2.0, %v1901_v28 }
 0x2b1   :  { %3218 = vmatprep.subr.mxu0 %v3678_v6  ;;  %3247 = vmatprep.subr.mxu1 %v3678_v6  ;;  %v2645_v27 = vsel %vm4894_vm15, 1.0, %v3678_v6  ;;  %v1909_v22 = vmul.f32 %v1900_v49, %v1897_v45  ;;  %v1910_v1 = vmul.f32 2.0, %v1902_v29  ;;  %v1912_v4 = vmul.f32 2.0, %v1903_v21  ;;  %vm4399_vm15 = vmpackc.low %vm977_vm12, %vm976_vm9 }
 0x2b2   :  { %v1914_v7 = vmul.f32 2.0, %v1904_v51  ;;  %v1917_v11 = vmul.f32 2.0, %v1905_v53  ;;  %v1924_v15 = vmul.f32 2.0, %v1906_v35  ;;  %v1918_v57 = vmul.f32 2.0, %v1908_v58  ;;  %vm3542_vm9 = vmpackc.low %vm1017_vm11, %vm1016_vm6 }
 0x2b3   :  { %v1911_v17 = vsub.f32 1.0, %v1910_v1  ;;  %v1915_v18 = vmul.f32 2.0, %v1909_v22  ;;  %v1925_v20 = vmul.f32 2.0, %v1907_v50  ;;  %v1922_v24 = vsub.f32 1.0, %v1921_v13  ;;  %vm3527_vm12 = vmpackc.low %vm979_vm14, %vm978_vm13 }
 0x2b4   :  { %3219 = vmatpush3.msk.msra.mxu0 %vm4897_vm8, %v2632_v26  ;;  %3248 = vmatpush3.msk.msra.mxu1 %vm4898_vm0, %v2645_v27  ;;  %v4373_v16 = vpop.f32.mrb[6].mxu1  ;;  %v4407_v41 = vadd.f32 %v1918_v57, %v1917_v11  ;;  %v4423_v49 = vsub.f32 %v1917_v11, %v1918_v57  ;;  %vm3545_vm6 = vmpackc.low %vm1019_vm4, %vm1018_vm5  ;;  %vm980_vm11 = vcmp.eq.s32.totalorder %v3846_v44, %v4239_v8 }
 0x2b5   :  { %3221 = vmatmul.mubr.msk.f32.vlgmr.msra.gmra.mrb[12].mxu0 %vm4901_vm1, %v4165_v47  ;;  %3250 = vmatmul.mubr.msk.f32.vlgmr.msra.gmra.mrb[10].mxu1 %vm4902_vm7, %v4165_v47  ;;  %v3135_v23 = vpop.f32.mrb[7].mxu1  ;;  %v1933_v25 = vmul.f32 %v4373_v16, %v4373_v16  ;;  %v4403_v31 = vsub.f32 %v1911_v17, %v1912_v4  ;;  %v4405_v38 = vsub.f32 %v1914_v7, %v1915_v18 }
 0x2b6   :  { %3520 = vmatprep.subr.bf16.mxu0 %v3676_v3  ;;  %3538 = vmatprep.subr.bf16.mxu1 %v3676_v3  ;;  %v4417_v45 = vadd.f32 %v1915_v18, %v1914_v7  ;;  %v4419_v46 = vsub.f32 %v1922_v24, %v1912_v4  ;;  %v4421_v48 = vsub.f32 %v1924_v15, %v1925_v20 }
 0x2b7   :  { %3522 = vmatpush3.bf16.msk.msra.mxu0 %vm4357_vm3, %v3679_v42  ;;  %3540 = vmatpush3.bf16.msk.msra.mxu1 %vm4369_vm2, %v3679_v42  ;;  %v4425_v26 = vadd.f32 %v1925_v20, %v1924_v15  ;;  %v1934_v27 = vadd.f32 %v1933_v25, %v4280_v19  ;;  %v4432_v28 = vsub.f32 %v1922_v24, %v1910_v1 }
 0x2b8   :  { %3523 = vmatprep.subr.bf16.mxu0 %v3676_v3  ;;  %3541 = vmatprep.subr.bf16.mxu1 %v3676_v3  ;;  %vm981_vm3 = vcmp.eq.s32.totalorder %v3994_v60, %v4239_v8  ;;  %vm1020_vm13 = vcmp.eq.s32.totalorder %v3846_v44, %v4270_v14  ;;  %vm1021_vm14 = vcmp.eq.s32.totalorder %v3994_v60, %v4270_v14 }
 0x2b9   :  { %3278 = vmatprep.mubr.msk.f32.mxu0 %vm4881_vm10, %v3678_v6  ;;  %3307 = vmatprep.mubr.msk.f32.mxu1 %vm4881_vm10, %v3678_v6  ;;  %v1935_v29 = vmax.f32 %v1934_v27, 1e-16  ;;  %vm3530_vm8 = vmpackc.low %vm981_vm3, %vm980_vm11  ;;  %vm982_vm2 = vcmp.eq.s32.totalorder %v4003_v61, %v4239_v8  ;;  %vm983_vm1 = vcmp.eq.s32.totalorder %v4006_v62, %v4239_v8  ;;  %vm1022_vm7 = vcmp.eq.s32.totalorder %v4003_v61, %v4270_v14 }
 0x2ba   :  { %vm3548_vm0 = vmpackc.low %vm1021_vm14, %vm1020_vm13  ;;  %vm1023_vm5 = vcmp.eq.s32.totalorder %v4006_v62, %v4270_v14  ;;  %vm1025_vm11 = vcmp.eq.s32.totalorder %v4018_v0, %v4270_v14  ;;  %vm986_vm13 = vcmp.eq.s32.totalorder %v4100_v10, %v4239_v8 }
 0x2bb   :  { %3525 = vmatpush3.bf16.msk.msra.mxu0 %vm4399_vm15, %v3679_v42  ;;  %3543 = vmatpush3.bf16.msk.msra.mxu1 %vm3542_vm9, %v3679_v42  ;;  %3619 = vrsqrt.f32 %v1935_v29  ;;  %vm3533_vm4 = vmpackc.low %vm983_vm1, %vm982_vm2  ;;  %vm984_vm9 = vcmp.eq.s32.totalorder %v4015_v63, %v4239_v8  ;;  %v2658_v50 = vsel %vm986_vm13, 1.0, %v3678_v6  ;;  %vm1496_vm2 = vcmp.eq.s32.totalorder %v3812_v34, %v3809_v33 }
 0x2bc   :  { %3526 = vmatprep.subr.bf16.mxu0 %v3676_v3  ;;  %3544 = vmatprep.subr.bf16.mxu1 %v3676_v3  ;;  %vm3551_vm15 = vmpackc.low %vm1023_vm5, %vm1022_vm7  ;;  %vm4905_vm1 = vcmask 1042432   ;;  %vm1500_vm13 = vcmp.eq.s32.totalorder %v3825_v40, %v3809_v33 }
 0x2bd   :  { %vm4906_vm7 = vmmov %vm4905_vm1 }
 0x2bf   :  { %3528 = vmatpush3.bf16.msk.msra.mxu0 %vm3527_vm12, %v3679_v42  ;;  %3546 = vmatpush3.bf16.msk.msra.mxu1 %vm3545_vm6, %v3679_v42  ;;  %vm985_vm12 = vcmp.eq.s32.totalorder %v4018_v0, %v4239_v8  ;;  %vm1024_vm6 = vcmp.eq.s32.totalorder %v4015_v63, %v4270_v14 }
 0x2c0   :  { %3529 = vmatprep.subr.bf16.mxu0 %v3676_v3  ;;  %3547 = vmatprep.subr.bf16.mxu1 %v3676_v3  ;;  %vm3536_vm3 = vmpackc.low %vm985_vm12, %vm984_vm9  ;;  %vm1497_vm9 = vcmp.eq.s32.totalorder %v3816_v36, %v3809_v33  ;;  %vm1498_vm12 = vcmp.eq.s32.totalorder %v3819_v37, %v3809_v33  ;;  %v3636_v36 = vld [vmem:[%s4848_s0] sm:$0xff] }
 0x2c1   :  { %vm3554_vm14 = vmpackc.low %vm1025_vm11, %vm1024_vm6 }
 0x2c2   :  { %vm4539_vm11 = vmpackc.low %vm1498_vm12, %vm1497_vm9 }
 0x2c3   :  { %3531 = vmatpush3.bf16.msk.msra.mxu0 %vm3530_vm8, %v3679_v42  ;;  %3549 = vmatpush3.bf16.msk.msra.mxu1 %vm3548_vm0, %v3679_v42  ;;  %vm1026_vm8 = vcmp.eq.s32.totalorder %v4100_v10, %v4270_v14  ;;  %vm1495_vm0 = vcmp.eq.s32.totalorder %v3807_v32, %v3809_v33 }
 0x2c4   :  { %3532 = vmatprep.subr.bf16.mxu0 %v3676_v3  ;;  %3550 = vmatprep.subr.bf16.mxu1 %v3676_v3  ;;  %vm4517_vm5 = vmpackc.low %vm1496_vm2, %vm1495_vm0  ;;  %vm1517_vm0 = vcmp.eq.s32.totalorder %v4003_v61, %v3809_v33  ;;  %v3635_v61 = vld [vmem:[%s4849_s1] sm:$0xff] }
 0x2c5   :  { %v3620_v19 = vpop.eup %3619 }
 0x2c6   :  { %v4490_v21 = vmul.f32 %v3620_v19, %v1935_v29  ;;  %v4493_v51 = vmul.f32 %v3620_v19, %v4241_v9  ;;  %v4496_v53 = vmul.f32 %v3620_v19, %v4121_v43  ;;  %v4501_v35 = vmul.f32 %v3620_v19, %v4373_v16 }
 0x2c7   :  { %3534 = vmatpush3.bf16.msk.msra.mxu0 %vm3533_vm4, %v3679_v42  ;;  %3552 = vmatpush3.bf16.msk.msra.mxu1 %vm3551_vm15, %v3679_v42  ;;  %v2671_v43 = vsel %vm1026_vm8, 1.0, %v3678_v6  ;;  %vm4909_vm4 = vcmask 809984   ;;  %vm1516_vm8 = vcmp.eq.s32.totalorder %v3994_v60, %v3809_v33 }
 0x2c8   :  { %3535 = vmatprep.subr.bf16.mxu0 %v3676_v3  ;;  %3553 = vmatprep.subr.bf16.mxu1 %v3676_v3  ;;  %v1944_v8 = vand.u32 2139095040, %v4490_v21  ;;  %v1941_v14 = vand.u32 2147483647, %v4490_v21  ;;  %vm4910_vm15 = vmmov %vm4909_vm4 }
 0x2ca   :  { %v1945_v9 = vshrl.u32 %v1944_v8, 23  ;;  %v1948_v34 = vand.u32 8388607, %v1941_v14 }
 0x2cb   :  { %3537 = vmatpush3.bf16.msk.msra.mxu0 %vm3536_vm3, %v3679_v42  ;;  %3555 = vmatpush3.bf16.msk.msra.mxu1 %vm3554_vm14, %v3679_v42  ;;  %vm1499_vm3 = vcmp.eq.s32.totalorder %v3822_v39, %v3809_v33  ;;  %vm1501_vm14 = vcmp.eq.s32.totalorder %v3846_v44, %v3809_v33 }
 0x2cc   :  { %3276 = vmatprep.subr.mxu0 %v3678_v6  ;;  %3305 = vmatprep.subr.mxu1 %v3678_v6  ;;  %v2799_v55 = vadd.s32 4294967169, %v1945_v9  ;;  %v1949_v1 = vor.u32 8388608, %v1948_v34  ;;  %vm4572_vm2 = vmpackc.low %vm1500_vm13, %vm1499_vm3  ;;  %v4587_v39 = vsel %vm1501_vm14, 1.0, %v3678_v6  ;;  %vm1520_vm3 = vcmp.eq.s32.totalorder %v4018_v0, %v3809_v33 }
 0x2ce   :  { %v1951_v32 = vadd.s32 1, %v2799_v55  ;;  %v1989_v25 = vshll.u32 %v1949_v1, 8 }
 0x2cf   :  { %3277 = vmatpush3.msk.msra.mxu0 %vm4905_vm1, %v2658_v50  ;;  %3306 = vmatpush3.msk.msra.mxu1 %vm4906_vm7, %v2671_v43  ;;  %vm1518_vm1 = vcmp.eq.s32.totalorder %v4006_v62, %v3809_v33 }
 0x2d0   :  { %3279 = vmatmul.mubr.msk.f32.vlgmr.msra.gmra.mrb[14].mxu0 %vm4909_vm4, %v4165_v47  ;;  %3308 = vmatmul.mubr.msk.f32.vlgmr.msra.gmra.mrb[12].mxu1 %vm4910_vm15, %v4165_v47  ;;  %vm1952_vm6 = vcmp.gt.s32.totalorder %v1951_v32, 0  ;;  %vm3575_vm15 = vmpackc.low %vm1516_vm8, %vm1501_vm14  ;;  %vm4915_vm14 = vcmask 1042432   ;;  %vm4916_vm8 = vcmask 416768  }
 0x2d1   :  { %3565 = vmatprep.subr.bf16.mxu1 %v3676_v3  ;;  %3353 = vmatprep.mubr.msk.f32.mxu1 %vm4881_vm10, %v3678_v6  ;;  %v1953_v37 = vsel %vm1952_vm6, %v1951_v32, 0  ;;  %vm1519_vm6 = vcmp.eq.s32.totalorder %v4015_v63, %v3809_v33  ;;  %vm3578_vm13 = vmpackc.low %vm1518_vm1, %vm1517_vm0 }
 0x2d2   :  { %3567 = vmatpush3.bf16.msk.msra.mxu1 %vm4517_vm5, %v3679_v42  ;;  %3556 = vmatprep.subr.bf16.mxu0 %v3676_v3  ;;  %v1955_v22 = vand.u32 31, %v1953_v37  ;;  %v1954_v4 = vshrl.u32 %v1953_v37, 5  ;;  %vm3581_vm0 = vmpackc.low %vm1520_vm3, %vm1519_vm6 }
 0x2d3   :  { %3568 = vmatprep.subr.bf16.mxu1 %v3676_v3  ;;  %3558 = vmatpush3.bf16.msk.msra.mxu0 %vm4517_vm5, %v3679_v42 }
 0x2d4   :  { %3559 = vmatprep.subr.bf16.mxu0 %v3676_v3  ;;  %3324 = vmatprep.mubr.msk.f32.mxu0 %vm4881_vm10, %v3678_v6  ;;  %v1956_v5 = vsub.s32 32, %v1955_v22  ;;  %v1958_v7 = vshll.u32 %v3680_v52, %v1955_v22  ;;  %v1961_v11 = vshll.u32 %v3681_v54, %v1955_v22  ;;  %v1964_v13 = vshll.u32 %v3682_v56, %v1955_v22 }
 0x2d5   :  { %v1967_v16 = vshll.u32 %v3683_v59, %v1955_v22  ;;  %v1970_v17 = vshll.u32 %v3684_v2, %v1955_v22  ;;  %vm1973_vm7 = vcmp.lt.s32.totalorder %v1954_v4, 1  ;;  %vm1976_vm4 = vcmp.lt.s32.totalorder %v1954_v4, 4 }
 0x2d6   :  { %3570 = vmatpush3.bf16.msk.msra.mxu1 %vm4539_vm11, %v3679_v42  ;;  %v1957_v40 = vshrl.u32 %v3680_v52, %v1956_v5  ;;  %v1959_v18 = vshrl.u32 %v3681_v54, %v1956_v5  ;;  %v1962_v57 = vshrl.u32 %v3682_v56, %v1956_v5  ;;  %v1965_v20 = vshrl.u32 %v3683_v59, %v1956_v5 }
 0x2d7   :  { %3571 = vmatprep.subr.bf16.mxu1 %v3676_v3  ;;  %3561 = vmatpush3.bf16.msk.msra.mxu0 %vm4539_vm11, %v3679_v42  ;;  %v1968_v23 = vshrl.u32 %v3684_v2, %v1956_v5  ;;  %v1971_v24 = vshrl.u32 %v3685_v12, %v1956_v5  ;;  %vm1974_vm9 = vcmp.lt.s32.totalorder %v1954_v4, 2  ;;  %vm1975_vm12 = vcmp.lt.s32.totalorder %v1954_v4, 3 }
 0x2d8   :  { %3562 = vmatprep.subr.bf16.mxu0 %v3676_v3  ;;  %v1960_v30 = vor.u32 %v1959_v18, %v1958_v7  ;;  %v1963_v52 = vor.u32 %v1962_v57, %v1961_v11  ;;  %v1966_v27 = vor.u32 %v1965_v20, %v1964_v13 }
 0x2d9   :  { %v1969_v54 = vor.u32 %v1968_v23, %v1967_v16  ;;  %v1972_v56 = vor.u32 %v1971_v24, %v1970_v17 }
 0x2da   :  { %3573 = vmatpush3.bf16.msk.msra.mxu1 %vm4572_vm2, %v3679_v42  ;;  %v1977_v59 = vsel %vm1973_vm7, %v1957_v40, %v1960_v30  ;;  %v1978_v2 = vsel %vm1976_vm4, %v1966_v27, 2102212464  ;;  %v1981_v12 = vsel %vm1973_vm7, %v1960_v30, %v1963_v52  ;;  %v1985_v29 = vsel %vm1973_vm7, %v1963_v52, %v1966_v27 }
 0x2db   :  { %3574 = vmatprep.subr.bf16.mxu1 %v3676_v3  ;;  %3564 = vmatpush3.bf16.msk.msra.mxu0 %vm4572_vm2, %v3679_v42  ;;  %v1979_v44 = vsel %vm1975_vm12, %v1963_v52, %v1978_v2  ;;  %v1982_v60 = vsel %vm1976_vm4, %v1969_v54, 920167782  ;;  %v1986_v19 = vsel %vm1976_vm4, %v1972_v56, 1326507024  ;;  %vm1521_vm7 = vcmp.eq.s32.totalorder %v4100_v10, %v3809_v33  ;;  %vm4917_vm4 = vmmov %vm4915_vm14 }
 0x2dc   :  { %3322 = vmatprep.subr.mxu0 %v3678_v6  ;;  %v1983_v8 = vsel %vm1975_vm12, %v1966_v27, %v1982_v60  ;;  %v1987_v50 = vsel %vm1975_vm12, %v1969_v54, %v1986_v19  ;;  %v1980_v43 = vsel %vm1974_vm9, %v1977_v59, %v1979_v44  ;;  %v2768_v63 = vsel %vm1521_vm7, 1.0, %v3678_v6  ;;  %v3637_v59 = vld [vmem:[%s4850_s2] sm:$0xff]  ;;  %v3639_v19 = vld [vmem:[%s4850_s2 + $0x8] sm:$0xff] }
 0x2dd   :  { %v1984_v9 = vsel %vm1974_vm9, %v1981_v12, %v1983_v8  ;;  %v1988_v55 = vsel %vm1974_vm9, %v1985_v29, %v1987_v50  ;;  %v1996_v62 = vmul.u32 %v1989_v25, %v1980_v43  ;;  %vm1942_vm9 = vcmp.le.f32.partialorder %v1941_v14, 0.7853982  ;;  %v3638_v29 = vld [vmem:[%s4850_s2 + $0x10] sm:$0xff]  ;;  %v3640_v43 = vld [vmem:[%s4850_s2 + $0x18] sm:$0xff] }
 0x2de   :  { %3576 = vmatpush3.bf16.msk.msra.mxu1 %vm3575_vm15, %v3679_v42  ;;  %v4630_v32 = vmul.u32.u64.low %v1989_v25, %v1988_v55  ;;  %v4631_v34 = vmul.u32.u64.high %v1989_v25, %v1988_v55, %v4630_v32  ;;  %v4633_v37 = vmul.u32.u64.low %v1989_v25, %v1984_v9  ;;  %v4634_v22 = vmul.u32.u64.high %v1989_v25, %v1984_v9, %v4633_v37 }
 0x2df   :  { %3577 = vmatprep.subr.bf16.mxu1 %v3676_v3  ;;  %3323 = vmatpush3.msk.msra.mxu0 %vm4915_vm14, %v4587_v39  ;;  %vm4918_vm15 = vcmask 809984   ;;  %v2383_v2 = vmul.f32 %v3637_v59, %v3637_v59  ;;  %vm4921_vm12 = vcmask 261120   ;;  %v2385_v14 = vmul.f32 %v3638_v29, %v3638_v29 }
 0x2e0   :  { %3325 = vmatmul.mubr.msk.f32.vlgmr.msra.gmra.mrb[16].mxu0 %vm4916_vm8, %v3635_v61  ;;  %vm1998_vm1 = vc.u32 %v4631_v34, %v4633_v37  ;;  %v1999_v1 = vadd.s32 1, %v4634_v22  ;;  %v1997_v16 = vadd.s32 %v4633_v37, %v4631_v34  ;;  %vm4922_vm6 = vmmov %vm4921_vm12  ;;  %v2384_v8 = vmul.f32 %v3639_v19, %v3639_v19  ;;  %v3641_v37 = vld [vmem:[%s4850_s2 + $0x20] sm:$0xff] }
 0x2e1   :  { %v2390_v12 = vsel %vm4921_vm12, %v2383_v2, 0.0  ;;  %v2396_v60 = vsel %vm4922_vm6, %v2385_v14, 0.0  ;;  %vm4923_vm3 = vmmov %vm4922_vm6  ;;  %v2386_v9 = vmul.f32 %v3640_v43, %v3640_v43  ;;  %vm2408_vm12 = vcmask 256000  }
 0x2e2   :  { %3579 = vmatpush3.bf16.msk.msra.mxu1 %vm3578_vm13, %v3679_v42  ;;  %v2000_v4 = vsel %vm1998_vm1, %v1999_v1, %v4634_v22  ;;  %2391 = vadd.xlane.f32.xlu0 %v2390_v12  ;;  %v2393_v50 = vsel %vm4923_vm3, %v2384_v8, 0.0  ;;  %vm4924_vm13 = vmmov %vm4923_vm3  ;;  %v2387_v22 = vmul.f32 %v3641_v37, %v3641_v37  ;;  %vm4930_vm6 = vcmask 809984  }
 0x2e3   :  { %3580 = vmatprep.subr.bf16.mxu1 %v3676_v3  ;;  %v2001_v5 = vadd.s32 %v2000_v4, %v1996_v62  ;;  %2397 = vadd.xlane.f32.xlu1 %v2396_v60  ;;  %v2399_v34 = vsel %vm4924_vm13, %v2386_v9, 0.0  ;;  %vm4925_vm14 = vmmov %vm4923_vm3  ;;  %v3642_v62 = vld [vmem:[%s4852_s4] sm:$0xff] }
 0x2e4   :  { %v2402_v61 = vsel %vm4925_vm14, %v2387_v22, 0.0  ;;  %v2433_v1 = vmul.f32 %v3642_v62, %v3642_v62 }
 0x2e5   :  { %v2002_v7 = vadd.s32 536870912, %v2001_v5 }
 0x2e6   :  { %3582 = vmatpush3.bf16.msk.msra.mxu1 %vm3581_vm0, %v3679_v42  ;;  %2394 = vadd.xlane.f32.xlu0 %v2393_v50 }
 0x2e7   :  { %3351 = vmatprep.subr.mxu1 %v3678_v6  ;;  %v2003_v0 = vshrl.u32 %v2002_v7, 30  ;;  %2400 = vadd.xlane.f32.xlu1 %v2399_v34 }
 0x2e9   :  { %v2004_v33 = vshll.u32 %v2003_v0, 30  ;;  %v2027_v24 = vsub.s32 4, %v2003_v0 }
 0x2ea   :  { %3352 = vmatpush3.msk.msra.mxu1 %vm4917_vm4, %v2768_v63  ;;  %2403 = vadd.xlane.f32.xlu0 %v2402_v61 }
 0x2eb   :  { %3354 = vmatmul.mubr.msk.f32.vlgmr.msra.gmra.mrb[14].mxu1 %vm4918_vm15, %v4165_v47  ;;  %3583 = vmatprep.subr.bf16.mxu1 %v3676_v3  ;;  %v2005_v10 = vsub.s32 %v2001_v5, %v2004_v33  ;;  %vm2033_vm15 = vweird.f32 %v4490_v21 }
 0x2ec   :  { %3585 = vmatpush3.bf16.msk.msra.mxu1 %vm4517_vm5, %v3679_v42  ;;  %3370 = vmatprep.mubr.msk.f32.mxu1 %vm4881_vm10, %v3678_v6  ;;  %vm4919_vm10 = vmmov %vm4917_vm4 }
 0x2ed   :  { %3586 = vmatprep.subr.bf16.mxu1 %v3676_v3  ;;  %v2007_v11 = vsub.s32 0, %v2005_v10  ;;  %vm4926_vm4 = vmmov %vm4923_vm3 }
 0x2ee   :  { %v2437_v7 = vsel %vm4926_vm4, %v2433_v1, 0.0 }
 0x2ef   :  { %v2800_v47 = vmin.u32 %v2007_v11, %v2005_v10  ;;  %2438 = vadd.xlane.f32.xlu1 %v2437_v7 }
 0x2f0   :  { %3588 = vmatpush3.bf16.msk.msra.mxu1 %vm4539_vm11, %v3679_v42  ;;  %vm4920_vm11 = vmmov %vm4916_vm8 }
 0x2f1   :  { %3589 = vmatprep.subr.bf16.mxu1 %v3676_v3  ;;  %v2009_v58 = vclz %v2800_v47 }
 0x2f3   :  { %v2801_v13 = vadd.s32 4294967294, %v2009_v58 }
 0x2f4   :  { %3591 = vmatpush3.bf16.msk.msra.mxu1 %vm4572_vm2, %v3679_v42  ;;  %vm1943_vm2 = vcmp.lt.s32.totalorder %v4490_v21, 0 }
 0x2f5   :  { %3368 = vmatprep.subr.mxu1 %v3678_v6  ;;  %vm2802_vm5 = vcmp.lt.s32.totalorder %v2801_v13, 0  ;;  %v2028_v52 = vsel %vm1943_vm2, %v2027_v24, %v2003_v0  ;;  %v3643_v0 = vld [vmem:[%s4852_s4 + $0x8] sm:$0xff] }
 0x2f6   :  { %v2012_v3 = vsel %vm2802_vm5, 0, %v2801_v13  ;;  %v2030_v56 = vsel %vm1942_vm9, 0, %v2028_v52  ;;  %v2434_v33 = vmul.f32 %v3643_v0, %v3643_v0  ;;  %v3644_v13 = vld [vmem:[%s4850_s2 + $0x28] sm:$0xff] }
 0x2f7   :  { %v2013_v17 = vsub.s32 32, %v2012_v3  ;;  %v2014_v15 = vshll.u32 %v2005_v10, %v2012_v3  ;;  %v2017_v42 = vsub.s32 4294967266, %v2012_v3  ;;  %v2034_v44 = vadd.s32 3, %v2030_v56 }
 0x2f8   :  { %3369 = vmatpush3.msk.msra.mxu1 %vm4919_vm10, %v4587_v39  ;;  %v2138_v32 = vand.u32 3, %v2030_v56 }
 0x2f9   :  { %3371 = vmatmul.mubr.msk.f32.vlgmr.msra.gmra.mrb[14].mxu1 %vm4920_vm11, %v3636_v36  ;;  %v2015_v40 = vshrl.u32 %v1997_v16, %v2013_v17  ;;  %v2018_v18 = vadd.s32 127, %v2017_v42  ;;  %v2035_v55 = vand.u32 3, %v2034_v44  ;;  %vm4927_vm11 = vmmov %vm4923_vm3  ;;  %v2388_v16 = vmul.f32 %v3644_v13, %v3644_v13 }
 0x2fa   :  { %vm2140_vm0 = vcmp.eq.s32.totalorder %v2138_v32, 0  ;;  %vm2143_vm1 = vcmp.eq.s32.totalorder %v2138_v32, 2  ;;  %vm2139_vm5 = vcmp.lt.s32.totalorder %v2138_v32, 2  ;;  %v2440_v58 = vsel %vm4927_vm11, %v2434_v33, 0.0 }
 0x2fb   :  { %v2016_v6 = vor.u32 %v2015_v40, %v2014_v15  ;;  %v2019_v57 = vshll.u32 %v2018_v18, 23  ;;  %vm2040_vm8 = vcmp.eq.s32.totalorder %v2035_v55, 2  ;;  %vm2037_vm7 = vcmp.eq.s32.totalorder %v2035_v55, 0  ;;  %2441 = vadd.xlane.f32.xlu0 %v2440_v58  ;;  %v3645_v40 = vld [vmem:[%s4852_s4 + $0x10] sm:$0xff] }
 0x2fc   :  { %vm2036_vm10 = vcmp.lt.s32.totalorder %v2035_v55, 2  ;;  %v2435_v18 = vmul.f32 %v3645_v40, %v3645_v40  ;;  %v3649_v55 = vld [vmem:[%s4852_s4 + $0x18] sm:$0xff] }
 0x2fd   :  { %v2020_v20 = vor.u32 4788187, %v2019_v57  ;;  %v2023_v23 = vcvt.s32.f32 %v2016_v6  ;;  %v2436_v32 = vmul.f32 %v3649_v55, %v3649_v55 }
 0x2ff   :  { %v2021_v39 = vand.u32 2147483647, %v2020_v20 }
 0x301   :  { %v2024_v25 = vmul.f32 %v2023_v23, %v2021_v39 }
 0x303   :  { %v2025_v30 = vxor.u32 2147483648, %v2024_v25 }
 0x305   :  { %v2026_v27 = vsel %vm1943_vm2, %v2025_v30, %v2024_v25  ;;  %vm4928_vm2 = vmmov %vm4923_vm3  ;;  %v3646_v25 = vld [vmem:[%s4854_s6] sm:$0xff] }
 0x306   :  { %v2029_v54 = vsel %vm1942_vm9, %v4490_v21, %v2026_v27  ;;  %v2405_v42 = vsel %vm4928_vm2, %v2388_v16, 0.0  ;;  %vm4929_vm9 = vmmov %vm4928_vm2  ;;  %v2466_v30 = vmul.f32 %v3646_v25, %v3646_v25  ;;  %v3647_v21 = vld [vmem:[%s4854_s6 + $0x8] sm:$0xff] }
 0x307   :  { %3621 = vcosq.f32 %v2029_v54  ;;  %2406 = vadd.xlane.f32.xlu1 %v2405_v42  ;;  %v2443_v24 = vsel %vm4929_vm9, %v2435_v18, 0.0  ;;  %v2467_v52 = vmul.f32 %v3647_v21, %v3647_v21  ;;  %vm4931_vm3 = vmmov %vm4930_vm6  ;;  %vm2502_vm9 = vcmask 0  }
 0x308   :  { %3623 = vsinq.f32 %v2029_v54  ;;  %2444 = vadd.xlane.f32.xlu0 %v2443_v24  ;;  %v2470_v12 = vsel %vm4930_vm6, %v2466_v30, 0.0  ;;  %vm4932_vm13 = vmmov %vm4928_vm2 }
 0x309   :  { %v2473_v29 = vsel %vm4931_vm3, %v2467_v52, 0.0  ;;  %vm4933_vm14 = vmmov %vm4931_vm3 }
 0x30b   :  { %2471 = vadd.xlane.f32.xlu1 %v2470_v12 }
 0x30c   :  { %2474 = vadd.xlane.f32.xlu0 %v2473_v29 }
 0x311   :  { %v3622_v4 = vpop.eup %3621 }
 0x312   :  { %v3624_v5 = vpop.eup %3623  ;;  %v2041_v63 = vxor.u32 2147483648, %v3622_v4 }
 0x313   :  { %v2038_v10 = vxor.u32 2147483648, %v3624_v5 }
 0x314   :  { %v2042_v11 = vsel %vm2040_vm8, %v2041_v63, %v3624_v5  ;;  %v2145_v47 = vsel %vm2143_vm1, %v2041_v63, %v3624_v5  ;;  %v3650_v5 = vld [vmem:[%s4854_s6 + $0x10] sm:$0xff]  ;;  %vm4934_vm8 = vmmov %vm4931_vm3  ;;  %vm2289_vm1 = vcmask 130048  }
 0x315   :  { %v2039_v36 = vsel %vm2037_vm7, %v3622_v4, %v2038_v10  ;;  %v2142_v3 = vsel %vm2140_vm0, %v3622_v4, %v2038_v10  ;;  %v2446_v4 = vsel %vm4932_vm13, %v2436_v32, 0.0  ;;  %v2468_v63 = vmul.f32 %v3650_v5, %v3650_v5 }
 0x316   :  { %v2043_v17 = vsel %vm2036_vm10, %v2039_v36, %v2042_v11  ;;  %v2146_v15 = vsel %vm2139_vm5, %v2142_v3, %v2145_v47  ;;  %2447 = vadd.xlane.f32.xlu0 %v2446_v4  ;;  %v3651_v47 = vld [vmem:[%s4854_s6 + $0x18] sm:$0xff]  ;;  %vm2372_vm0 = vcmask 23552   ;;  %vm4935_vm7 = vcmask 1042432   ;;  %s3686_s6 = smov [#allocation2]  }
 0x317   :  { %v2044_v6 = vsel %vm2033_vm15, nan, %v2043_v17  ;;  %v2147_v57 = vsel %vm2033_vm15, nan, %v2146_v15  ;;  %v2476_v11 = vsel %vm4933_vm14, %v2468_v63, 0.0  ;;  %v2469_v58 = vmul.f32 %v3651_v47, %v3651_v47  ;;  %s2510_s23 = sshll.u32 %s3686_s6, 4  ;;  %s2511_s23 = int_to_ptr.vmem [resolvable:$true] %s2510_s23 }
 0x318   :  { %v2148_v20 = vmul.f32 %v2044_v6, %v4493_v51  ;;  %v2149_v23 = vmul.f32 %v2044_v6, %v4496_v53  ;;  %v2150_v39 = vmul.f32 %v2044_v6, %v4501_v35  ;;  %v3648_v51 = vld [vmem:[%s4850_s2 + $0x30] sm:$0x7]  ;;  %s3652_s24 = scalar_lea.vmem %s2511_s23, 16  ;;  %s3656_s25 = scalar_lea.vmem %s2511_s23, 32 }
 0x319   :  { %v2389_v53 = vmul.f32 %v3648_v51, %v3648_v51  ;;  %v2479_v15 = vsel %vm4934_vm8, %v2469_v58, 0.0  ;;  %p3653_p0 = scmp.ne.s32.totalorder %s2511_s23, %s3652_s24  ;;  %p3657_p1 = scmp.lt.s32.totalorder %s2511_s23, %s2511_s23 }
 0x31a   :  { %v2153_v35 = vmul.f32 %v2150_v39, %v2150_v39  ;;  %v2154_v27 = vmul.f32 %v2149_v23, %v2148_v20  ;;  %v2155_v54 = vmul.f32 %v2150_v39, %v2148_v20  ;;  %v2157_v56 = vmul.f32 %v2148_v20, %v2147_v57  ;;  %2480 = vadd.xlane.f32.xlu0 %v2479_v15  ;;  %p3658_p2 = scmp.lt.s32.totalorder %s3656_s25, %s3652_s24 }
 0x31b   :  { %v2158_v59 = vmul.f32 %v2149_v23, %v2147_v57  ;;  %v2159_v2 = vmul.f32 %v2150_v39, %v2147_v57  ;;  %v2409_v50 = vsel %vm2408_vm12, %v2389_v53, 0.0  ;;  %v2151_v43 = vmul.f32 %v2148_v20, %v2148_v20 }
 0x31c   :  { %v2162_v14 = vmul.f32 2.0, %v2153_v35  ;;  %v4741_v44 = vmul.f32 2.0, %v2154_v27  ;;  %v4743_v60 = vmul.f32 2.0, %v2155_v54  ;;  %v4750_v9 = vmul.f32 2.0, %v2157_v56  ;;  %2410 = vadd.xlane.f32.xlu1 %v2409_v50  ;;  %p3659_p3 = por %p3658_p2, %p3657_p1 }
 0x31d   :  { %v4745_v19 = vmul.f32 2.0, %v2159_v2  ;;  %v4747_v8 = vmul.f32 2.0, %v2158_v59  ;;  %v2152_v34 = vmul.f32 %v2149_v23, %v2149_v23  ;;  %v2156_v37 = vmul.f32 %v2150_v39, %v2149_v23 }
 0x31e   :  { %v2171_v1 = vmul.f32 2.0, %v2151_v43  ;;  %p3660_p4 = pnand %p3659_p3, %p3653_p0 }
 0x31f   :  { %v2166_v22 = vsub.f32 %v4741_v44, %v4745_v19  ;;  %v4759_v61 = vadd.f32 %v4747_v8, %v4743_v60  ;;  %v2170_v62 = vadd.f32 %v4745_v19, %v4741_v44  ;;  %v2160_v7 = vmul.f32 2.0, %v2152_v34 }
 0x320   :  { %v4767_v0 = vmul.f32 2.0, %v2156_v37  ;;  %v2172_v33 = vsub.f32 1.0, %v2171_v1  ;;  %v2177_v10 = vsub.f32 %v4743_v60, %v4747_v8  ;;  %2477 = vadd.xlane.f32.xlu1 %v2476_v11 }
 0x321   :  { %v2161_v13 = vsub.f32 1.0, %v2160_v7 }
 0x322   :  { %v2176_v16 = vsub.f32 %v4767_v0, %v4750_v9  ;;  %v4777_v36 = vsub.f32 %v2172_v33, %v2162_v14  ;;  %v4781_v3 = vadd.f32 %v4750_v9, %v4767_v0  ;;  %v4783_v17 = vsub.f32 %v2172_v33, %v2160_v7 }
 0x323   :  { %v2163_v42 = vsub.f32 %v2161_v13, %v2162_v14 }
 0x36e   :  { %v1126_v40 = vpop.f32.mrb[10].mxu0  ;;  %v1199_v18 = vpop.f32.mrb[8].mxu1 }
 0x36f   :  { %v2180_v6 = vmul.f32 %v1126_v40, %v1126_v40  ;;  %v2181_v57 = vmul.f32 %v1199_v18, %v1199_v18  ;;  %v3164_v20 = vpop.f32.mrb[11].mxu0  ;;  %v3193_v23 = vpop.f32.mrb[9].mxu1 }
 0x371   :  { %v2182_v39 = vadd.f32 %v2181_v57, %v2180_v6 }
 0x388   :  { %v1272_v24 = vpop.f32.mrb[12].mxu0  ;;  %v1345_v25 = vpop.f32.mrb[10].mxu1 }
 0x389   :  { %v2183_v30 = vmul.f32 %v1272_v24, %v1272_v24  ;;  %v3222_v21 = vpop.f32.mrb[13].mxu0  ;;  %v3251_v52 = vpop.f32.mrb[11].mxu1 }
 0x38b   :  { %v2184_v51 = vadd.f32 %v2183_v30, %v2182_v39 }
 0x38d   :  { %v2185_v53 = vmax.f32 %v2184_v51, 1e-16 }
 0x38f   :  { %3625 = vrsqrt.f32 %v2185_v53 }
 0x399   :  { %v3626_v35 = vpop.eup %3625 }
 0x39a   :  { %v2189_v27 = vmul.f32 %v3626_v35, %v1272_v24  ;;  %v2188_v54 = vmul.f32 %v3626_v35, %v1199_v18  ;;  %v2187_v56 = vmul.f32 %v3626_v35, %v1126_v40 }
 0x39c   :  { %v2193_v59 = vmul.f32 %v2189_v27, %v1345_v25  ;;  %v2197_v2 = vmul.f32 %v2188_v54, %v1345_v25  ;;  %v2218_v12 = vmul.f32 %v2187_v56, %v4403_v31  ;;  %v2219_v29 = vmul.f32 %v2188_v54, %v4405_v38 }
 0x39d   :  { %v2221_v14 = vmul.f32 %v2189_v27, %v4407_v41  ;;  %v2241_v60 = vmul.f32 %v2187_v56, %v4417_v45  ;;  %v2242_v8 = vmul.f32 %v2188_v54, %v4419_v46  ;;  %v2244_v50 = vmul.f32 %v2189_v27, %v4421_v48 }
 0x39e   :  { %v2220_v43 = vadd.f32 %v2219_v29, %v2218_v12  ;;  %v2265_v55 = vmul.f32 %v2187_v56, %v4423_v49  ;;  %v2266_v32 = vmul.f32 %v2188_v54, %v4425_v26  ;;  %v2268_v34 = vmul.f32 %v2189_v27, %v4432_v28 }
 0x39f   :  { %v2243_v37 = vadd.f32 %v2242_v8, %v2241_v60 }
 0x3a0   :  { %v2222_v1 = vadd.f32 %v2221_v14, %v2220_v43  ;;  %v2267_v4 = vadd.f32 %v2266_v32, %v2265_v55 }
 0x3a1   :  { %v2245_v5 = vadd.f32 %v2244_v50, %v2243_v37 }
 0x3a2   :  { %v4795_v63 = vsub.f32 %v2222_v1, %v2163_v42  ;;  %v2269_v7 = vadd.f32 %v2268_v34, %v2267_v4 }
 0x3a3   :  { %v1418_v33 = vpop.f32.mrb[14].mxu0  ;;  %v1491_v11 = vpop.f32.mrb[12].mxu1  ;;  %v4797_v47 = vsub.f32 %v2245_v5, %v2170_v62 }
 0x3a4   :  { %v2191_v58 = vmul.f32 %v2189_v27, %v1418_v33  ;;  %v2196_v13 = vmul.f32 %v2187_v56, %v1418_v33  ;;  %v2190_v15 = vmul.f32 %v2188_v54, %v1491_v11  ;;  %v2194_v40 = vmul.f32 %v2187_v56, %v1491_v11  ;;  %v3280_v18 = vpop.f32.mrb[15].mxu0  ;;  %v3309_v6 = vpop.f32.mrb[13].mxu1 }
 0x3a5   :  { %v4799_v57 = vsub.f32 %v2269_v7, %v2177_v10  ;;  %v2247_v19 = vmul.f32 %v4797_v47, %v4797_v47  ;;  %v2392_v47 = vpop.xlane.xlu0 %2391 }
 0x3a6   :  { %v2198_v20 = vsub.f32 %v2196_v13, %v2197_v2  ;;  %v2192_v23 = vsub.f32 %v2190_v15, %v2191_v58  ;;  %v2195_v39 = vsub.f32 %v2193_v59, %v2194_v40 }
 0x3a8   :  { %v2199_v24 = vmul.f32 %v2192_v23, %v2192_v23  ;;  %v2200_v25 = vmul.f32 %v2195_v39, %v2195_v39  ;;  %v2202_v42 = vmul.f32 %v2198_v20, %v2198_v20 }
 0x3aa   :  { %v2201_v30 = vadd.f32 %v2200_v25, %v2199_v24 }
 0x3ac   :  { %v2203_v21 = vadd.f32 %v2202_v42, %v2201_v30 }
 0x3ae   :  { %v2204_v52 = vmax.f32 %v2203_v21, 1e-16  ;;  %v2224_v21 = vmul.f32 %v4795_v63, %v4795_v63 }
 0x3b0   :  { %3627 = vrsqrt.f32 %v2204_v52 }
 0x3b3   :  { %v1603_v62 = vpop.f32.mrb[16].mxu0 }
 0x3b4   :  { %v3326_v51 = vpop.f32.mrb[17].mxu0 }
 0x3ba   :  { %v3628_v53 = vpop.eup %3627 }
 0x3bb   :  { %v2206_v35 = vmul.f32 %v3628_v53, %v2192_v23  ;;  %v2207_v12 = vmul.f32 %v3628_v53, %v2195_v39  ;;  %v2208_v29 = vmul.f32 %v3628_v53, %v2198_v20 }
 0x3bd   :  { %v2209_v14 = vmul.f32 %v2207_v12, %v2189_v27  ;;  %v2213_v60 = vmul.f32 %v2206_v35, %v2189_v27  ;;  %v2233_v10 = vmul.f32 %v2206_v35, %v4403_v31  ;;  %v2234_v2 = vmul.f32 %v2207_v12, %v4405_v38 }
 0x3be   :  { %v2210_v59 = vmul.f32 %v2208_v29, %v2188_v54  ;;  %v2212_v8 = vmul.f32 %v2208_v29, %v2187_v56  ;;  %v2215_v50 = vmul.f32 %v2206_v35, %v2188_v54  ;;  %v2216_v43 = vmul.f32 %v2207_v12, %v2187_v56 }
 0x3bf   :  { %v2235_v55 = vadd.f32 %v2234_v2, %v2233_v10  ;;  %v2236_v32 = vmul.f32 %v2208_v29, %v4407_v41  ;;  %v2257_v34 = vmul.f32 %v2206_v35, %v4417_v45  ;;  %v2258_v37 = vmul.f32 %v2207_v12, %v4419_v46 }
 0x3c0   :  { %v2211_v1 = vsub.f32 %v2209_v14, %v2210_v59  ;;  %v2214_v4 = vsub.f32 %v2212_v8, %v2213_v60  ;;  %v2217_v5 = vsub.f32 %v2215_v50, %v2216_v43  ;;  %v2260_v27 = vmul.f32 %v2208_v29, %v4421_v48  ;;  %v2398_v50 = vpop.xlane.xlu1 %2397  ;;  %v2395_v43 = vpop.xlane.xlu0 %2394 }
 0x3c1   :  { %v2237_v7 = vadd.f32 %v2236_v32, %v2235_v55  ;;  %v2259_v33 = vadd.f32 %v2258_v37, %v2257_v34  ;;  %v2281_v11 = vmul.f32 %v2206_v35, %v4423_v49  ;;  %v2282_v58 = vmul.f32 %v2207_v12, %v4425_v26 }
 0x3c2   :  { %v2225_v54 = vmul.f32 %v2211_v1, %v4403_v31  ;;  %v2226_v56 = vmul.f32 %v2214_v4, %v4405_v38  ;;  %v2228_v13 = vmul.f32 %v2217_v5, %v4407_v41  ;;  %v2249_v15 = vmul.f32 %v2211_v1, %v4417_v45 }
 0x3c3   :  { %v2238_v40 = vsub.f32 %v2237_v7, %v4759_v61  ;;  %v2250_v18 = vmul.f32 %v2214_v4, %v4419_v46  ;;  %v2252_v6 = vmul.f32 %v2217_v5, %v4421_v48  ;;  %v2261_v20 = vadd.f32 %v2260_v27, %v2259_v33 }
 0x3c4   :  { %v2227_v23 = vadd.f32 %v2226_v56, %v2225_v54  ;;  %v2273_v39 = vmul.f32 %v2211_v1, %v4423_v49  ;;  %v2274_v24 = vmul.f32 %v2214_v4, %v4425_v26  ;;  %v2276_v31 = vmul.f32 %v2217_v5, %v4432_v28  ;;  %v2401_v55 = vpop.xlane.xlu1 %2400  ;;  %v2404_v32 = vpop.xlane.xlu0 %2403 }
 0x3c5   :  { %v2251_v25 = vadd.f32 %v2250_v18, %v2249_v15  ;;  %v2262_v38 = vsub.f32 %v2261_v20, %v2176_v16  ;;  %v2283_v41 = vadd.f32 %v2282_v58, %v2281_v11  ;;  %v2284_v46 = vmul.f32 %v2208_v29, %v4432_v28 }
 0x3c6   :  { %v2229_v45 = vadd.f32 %v2228_v13, %v2227_v23  ;;  %v2275_v61 = vadd.f32 %v2274_v24, %v2273_v39  ;;  %v2239_v28 = vmul.f32 %v2238_v40, %v2238_v40  ;;  %v2412_v1 = vadd.f32 %v2395_v43, %v2392_v47 }
 0x3c7   :  { %v2253_v42 = vadd.f32 %v2252_v6, %v2251_v25  ;;  %v2285_v30 = vadd.f32 %v2284_v46, %v2283_v41  ;;  %v2263_v14 = vmul.f32 %v2262_v38, %v2262_v38 }
 0x3c8   :  { %v2230_v48 = vsub.f32 %v2229_v45, %v2166_v22  ;;  %v2277_v49 = vadd.f32 %v2276_v31, %v2275_v61  ;;  %v2439_v34 = vpop.xlane.xlu1 %2438  ;;  %v2442_v37 = vpop.xlane.xlu0 %2441  ;;  %v2413_v5 = vadd.f32 %v2412_v1, %v2398_v50 }
 0x3c9   :  { %v2254_v26 = vsub.f32 %v2253_v42, %v4777_v36  ;;  %v2286_v0 = vsub.f32 %v2285_v30, %v4783_v17  ;;  %v2271_v17 = vmul.f32 %v4799_v57, %v4799_v57  ;;  %v2449_v58 = vadd.f32 %v2442_v37, %v2439_v34 }
 0x3ca   :  { %v2231_v52 = vmul.f32 %v2230_v48, %v2230_v48  ;;  %v2278_v9 = vsub.f32 %v2277_v49, %v4781_v3  ;;  %v2414_v7 = vadd.f32 %v2413_v5, %v2401_v55 }
 0x3cb   :  { %v2255_v12 = vmul.f32 %v2254_v26, %v2254_v26  ;;  %v2287_v2 = vmul.f32 %v2286_v0, %v2286_v0 }
 0x3cc   :  { %v2366_v16 = vpop.f32.mrb[14].mxu1  ;;  %v2232_v51 = vadd.f32 %v2231_v52, %v2224_v21  ;;  %v2279_v10 = vmul.f32 %v2278_v9, %v2278_v9  ;;  %v2407_v4 = vpop.xlane.xlu1 %2406  ;;  %v2415_v11 = vadd.f32 %v2414_v7, %v2404_v32 }
 0x3cd   :  { %v2370_v53 = vsub.f32 %v2366_v16, %v1603_v62  ;;  %v3372_v35 = vpop.f32.mrb[15].mxu1  ;;  %v2445_v27 = vpop.xlane.xlu0 %2444 }
 0x3ce   :  { %v2240_v44 = vadd.f32 %v2239_v28, %v2232_v51  ;;  %v2416_v56 = vadd.f32 %v2415_v11, %v2407_v4  ;;  %v2450_v13 = vadd.f32 %v2449_v58, %v2445_v27 }
 0x3cf   :  { %v2371_v22 = vmul.f32 %v2370_v53, %v2370_v53 }
 0x3d0   :  { %v2248_v36 = vadd.f32 %v2247_v19, %v2240_v44  ;;  %v2472_v57 = vpop.xlane.xlu1 %2471 }
 0x3d1   :  { %v2373_v29 = vsel %vm2372_vm0, %v2371_v22, 0.0  ;;  %v2475_v33 = vpop.xlane.xlu0 %2474 }
 0x3d2   :  { %2374 = vadd.xlane.f32.xlu0 %v2373_v29  ;;  %v2256_v63 = vadd.f32 %v2255_v12, %v2248_v36  ;;  %v2482_v18 = vadd.f32 %v2475_v33, %v2472_v57 }
 0x3d4   :  { %v2264_v3 = vadd.f32 %v2263_v14, %v2256_v63  ;;  %v2411_v54 = vpop.xlane.xlu1 %2410 }
 0x3d5   :  { %v2417_v15 = vsel %vm4935_vm7, %v2411_v54, 0.0  ;;  %v2448_v40 = vpop.xlane.xlu0 %2447 }
 0x3d6   :  { %v2272_v60 = vadd.f32 %v2271_v17, %v2264_v3  ;;  %v2418_v20 = vadd.f32 %v2417_v15, %v2416_v56  ;;  %v2451_v23 = vadd.f32 %v2450_v13, %v2448_v40 }
 0x3d8   :  { %v2280_v62 = vadd.f32 %v2279_v10, %v2272_v60  ;;  %v2478_v6 = vpop.xlane.xlu1 %2477  ;;  %v2419_v31 = vrot.slane %v2418_v20, 4  ;;  %v2452_v25 = vrot.slane %v2451_v23, 4 }
 0x3d9   :  { %v2483_v39 = vadd.f32 %v2482_v18, %v2478_v6  ;;  %v2481_v24 = vpop.xlane.xlu0 %2480 }
 0x3da   :  { %v2288_v59 = vadd.f32 %v2287_v2, %v2280_v62  ;;  %v2420_v41 = vadd.f32 %v2419_v31, %v2418_v20  ;;  %v2453_v45 = vadd.f32 %v2452_v25, %v2451_v23 }
 0x3db   :  { %v2484_v38 = vadd.f32 %v2483_v39, %v2481_v24 }
 0x3dc   :  { %v2290_v8 = vsel %vm2289_vm1, %v2288_v59, 0.0  ;;  %v2421_v46 = vrot.slane %v2420_v41, 2  ;;  %v2454_v42 = vrot.slane %v2453_v45, 2 }
 0x3dd   :  { %2291 = vadd.xlane.f32.xlu1 %v2290_v8  ;;  %v2485_v61 = vrot.slane %v2484_v38, 4 }
 0x3de   :  { %v2422_v49 = vadd.f32 %v2421_v46, %v2420_v41  ;;  %v2455_v30 = vadd.f32 %v2454_v42, %v2453_v45 }
 0x3df   :  { %v2486_v48 = vadd.f32 %v2485_v61, %v2484_v38 }
 0x3e0   :  { %v2423_v21 = vrot.slane %v2422_v49, 1  ;;  %v2456_v52 = vrot.slane %v2455_v30, 1 }
 0x3e1   :  { %v2487_v26 = vrot.slane %v2486_v48, 2 }
 0x3e2   :  { %v2424_v0 = vadd.f32 %v2423_v21, %v2422_v49  ;;  %v2457_v16 = vadd.f32 %v2456_v52, %v2455_v30 }
 0x3e3   :  { %v2488_v9 = vadd.f32 %v2487_v26, %v2486_v48 }
 0x3e4   :  { %3629 = vrsqrt.f32 %v2424_v0  ;;  %vm2427_vm4 = vcmp.eq.f32.partialorder %v2424_v0, inf  ;;  %vm2460_vm15 = vcmp.eq.f32.partialorder %v2457_v16, inf  ;;  %v2430_v14 = vand.u32 2147483648, %v2424_v0 }
 0x3e5   :  { %v2489_v51 = vrot.slane %v2488_v9, 1  ;;  %3631 = vrsqrt.f32 %v2457_v16  ;;  %vm2429_vm10 = vcmp.eq.f32.partialorder %v2424_v0, 0.0  ;;  %v2463_v10 = vand.u32 2147483648, %v2457_v16 }
 0x3e6   :  { %vm2462_vm5 = vcmp.eq.f32.partialorder %v2457_v16, 0.0 }
 0x3e7   :  { %v2490_v28 = vadd.f32 %v2489_v51, %v2488_v9 }
 0x3e9   :  { %3633 = vrsqrt.f32 %v2490_v28  ;;  %vm2493_vm11 = vcmp.eq.f32.partialorder %v2490_v28, inf  ;;  %v2496_v43 = vand.u32 2147483648, %v2490_v28  ;;  %vm2495_vm2 = vcmp.eq.f32.partialorder %v2490_v28, 0.0 }
 0x3ee   :  { %v3630_v44 = vpop.eup %3629 }
 0x3ef   :  { %v3632_v19 = vpop.eup %3631  ;;  %v2426_v36 = vmul.f32 %v3630_v44, %v2424_v0 }
 0x3f0   :  { %v2459_v12 = vmul.f32 %v3632_v19, %v2457_v16 }
 0x3f1   :  { %v2428_v17 = vsel %vm2427_vm4, %v2424_v0, %v2426_v36 }
 0x3f2   :  { %v2461_v60 = vsel %vm2460_vm15, %v2457_v16, %v2459_v12  ;;  %v2431_v47 = vsel %vm2429_vm10, %v2430_v14, %v2428_v17 }
 0x3f3   :  { %v3634_v63 = vpop.eup %3633  ;;  %v2464_v50 = vsel %vm2462_vm5, %v2463_v10, %v2461_v60 }
 0x3f4   :  { %v2492_v59 = vmul.f32 %v3634_v63, %v2490_v28  ;;  %v2465_v1 = vadd.f32 %v2464_v50, %v2431_v47 }
 0x3f6   :  { %v2494_v34 = vsel %vm2493_vm11, %v2490_v28, %v2492_v59 }
 0x3f7   :  { %v2497_v4 = vsel %vm2495_vm2, %v2496_v43, %v2494_v34 }
 0x3f8   :  { %v2498_v7 = vadd.f32 %v2497_v4, %v2465_v1 }
 0x3fa   :  { %v2500_v54 = vmul.f32 0.001, %v2498_v7 }
 0x45f   :  { %v2375_v53 = vpop.xlane.xlu0 %2374 }
 0x460   :  { %v2376_v35 = vrot.slane %v2375_v53, 4 }
 0x462   :  { %v2377_v22 = vadd.f32 %v2376_v35, %v2375_v53 }
 0x464   :  { %v2378_v29 = vrot.slane %v2377_v22, 2 }
 0x466   :  { %v2379_v62 = vadd.f32 %v2378_v29, %v2377_v22 }
 0x468   :  { %v2380_v55 = vrot.slane %v2379_v62, 1 }
 0x46a   :  { %v2292_v3 = vpop.xlane.xlu1 %2291  ;;  %v2381_v5 = vadd.f32 %v2380_v55, %v2379_v62 }
 0x46b   :  { %v2293_v2 = vrot.slane %v2292_v3, 4 }
 0x46c   :  { %v2382_v33 = vmul.f32 0.041666668, %v2381_v5 }
 0x46d   :  { %v2294_v8 = vadd.f32 %v2293_v2, %v2292_v3 }
 0x46f   :  { %v2295_v32 = vrot.slane %v2294_v8, 2 }
 0x471   :  { %v2296_v37 = vadd.f32 %v2295_v32, %v2294_v8 }
 0x473   :  { %v2297_v27 = vrot.slane %v2296_v37, 1 }
 0x475   :  { %v2298_v57 = vadd.f32 %v2297_v27, %v2296_v37 }
 0x477   :  { %v2299_v11 = vmul.f32 0.00086805556, %v2298_v57 }
 0x479   :  { %v2499_v58 = vadd.f32 %v2382_v33, %v2299_v11 }
 0x47b   :  { %v2501_v56 = vadd.f32 %v2500_v54, %v2499_v58 }
 0x47d   :  { %2503 = vst.msk [vmem:[#allocation2] sm:$0x1] %vm2502_vm9, %v2501_v56 }
 0x47e   :  { %3663 = shalt.err (!%p3660_p4)
}
 0x47f   :  { %s3664_s28 = scalar_lea.hbm %s4856_s8, 16 }
 0x480   :  { %p3665_p5 = scmp.ne.s32.totalorder %s4856_s8, %s3664_s28  ;;  %p3668_p6 = scmp.lt.u32.totalorder %s3664_s28, %s4856_s8 }
 0x482   :  { %p3670_p7 = pnand %p3668_p6, %p3665_p5 }
 0x484   :  { %3673 = shalt.err (!%p3670_p7)
}
 0x485   :  { %2513 = dma.vmem_to_hbm [thread:$0]  %s2511_s23, 16, %s4856_s8, [#allocation3]  }
 0x486   :  { %3674 = dma.done.wait [#allocation3], 16  }
 0x487   :  { %3675 = vsyncadd [#allocation3], 4294967280 }
 0x488   :  { %2517 = vsyncpa [#allocation3], 1 }

</bundles_post_ra>
